<compile_context>
chip_gen: v7x
topology: tpu7x:2x2x1
jax: 0.10.0
libtpu: 0.0.40
codegen_flags: <defaults>
</compile_context>

<pallas_src>
import functools

import jax
import jax.numpy as jnp
from jax import lax
from jax.experimental import pallas as pl
from jax.experimental.pallas import tpu as pltpu


def _sampler_kernel(ids_ref, perm_ref, adj_info_hbm, adj_ans_hbm,
                    out_info_ref, out_ans_ref, rows_vmem, copy_sems,
                    *, tile_b):
    """One grid step: gather `tile_b` rows of both tables via DMA, then do the
    column-subset gather as a single one-hot matmul on the MXU."""
    TB = tile_b
    Y = rows_vmem.shape[1]
    S_pad = perm_ref.shape[1]

    base = pl.program_id(0) * TB

    # --- Row gather: one DMA per (row, table) from HBM into the shared scratch.
    # rows_vmem layout: rows [0, TB)   <- adj_info rows
    #                   rows [TB, 2TB) <- adj_answer rows
    copies = []
    for b in range(TB):
        row = ids_ref[base + b]                       # scalar from SMEM prefetch
        cp_i = pltpu.make_async_copy(
            adj_info_hbm.at[pl.ds(row, 1), :],
            rows_vmem.at[pl.ds(b, 1), :],
            copy_sems.at[b])
        cp_a = pltpu.make_async_copy(
            adj_ans_hbm.at[pl.ds(row, 1), :],
            rows_vmem.at[pl.ds(TB + b, 1), :],
            copy_sems.at[TB + b])
        cp_i.start()
        cp_a.start()
        copies.append(cp_i)
        copies.append(cp_a)

    # --- Build the one-hot column selector while the row DMAs are in flight.
    # col_sel[y, s] = (y == perm[s]); exact 0.0 / 1.0 values.
    col_iota = lax.broadcasted_iota(jnp.int32, (Y, S_pad), 0)
    col_sel = (col_iota == perm_ref[...]).astype(jnp.float32)       # (Y, S_pad)

    for cp in copies:
        cp.wait()

    # --- Column gather: single fused MXU matmul for both tables.
    # Exact for values < 2^24 (one-hot selector, f32 accumulation, full precision).
    rows_f = rows_vmem[...].astype(jnp.float32)                     # (2*TB, Y)
    gathered = jnp.dot(rows_f, col_sel,
                       precision=lax.Precision.HIGHEST,
                       preferred_element_type=jnp.float32)          # (2*TB, S_pad)

    out_info_ref[...] = gathered[:TB, :].astype(jnp.int32)
    out_ans_ref[...] = gathered[TB:, :].astype(jnp.int32)


def uniform_neighbor_sampler(ids_idx, perm, adj_info, adj_answer, *, tile_b=8):
    """ids_idx: (B,) int32 row indices (after id2idx mapping, done in host glue).
       perm:    (S,) int32 column subset (randperm prefix).
       adj_info, adj_answer: (N, Y) int32 adjacency tables (stay in HBM).
       Returns: (adj_lists, adj_answer_lists), each (B, S) int32."""
    B = int(ids_idx.shape[0])
    S = int(perm.shape[0])
    N, Y = adj_info.shape

    TB = tile_b
    B_pad = ((B + TB - 1) // TB) * TB
    S_pad = ((S + 127) // 128) * 128          # lane-dense output stores

    # Pad batch indices with a valid row (0) and perm with a valid column (0);
    # the padded region is sliced away after the call.
    ids_padded = jnp.zeros((B_pad,), jnp.int32).at[:B].set(ids_idx.astype(jnp.int32))
    perm_padded = jnp.zeros((1, S_pad), jnp.int32).at[0, :S].set(perm.astype(jnp.int32))

    grid = (B_pad // TB,)

    out_shape = (jax.ShapeDtypeStruct((B_pad, S_pad), jnp.int32),
                 jax.ShapeDtypeStruct((B_pad, S_pad), jnp.int32))

    grid_spec = pltpu.PrefetchScalarGridSpec(
        num_scalar_prefetch=1,                       # ids -> SMEM, drives DMA gather
        grid=grid,
        in_specs=[
            pl.BlockSpec((1, S_pad), lambda i, ids: (0, 0)),   # perm (VMEM, shared)
            pl.BlockSpec(memory_space=pl.ANY),                 # adj_info   (raw HBM)
            pl.BlockSpec(memory_space=pl.ANY),                 # adj_answer (raw HBM)
        ],
        out_specs=(
            pl.BlockSpec((TB, S_pad), lambda i, ids: (i, 0)),
            pl.BlockSpec((TB, S_pad), lambda i, ids: (i, 0)),
        ),
        scratch_shapes=[
            pltpu.VMEM((2 * TB, Y), jnp.int32),      # gathered rows (info | answer)
            pltpu.SemaphoreType.DMA((2 * TB,)),      # one sem per row DMA
        ],
    )

    kernel = functools.partial(_sampler_kernel, tile_b=TB)

    out_info, out_ans = pl.pallas_call(
        kernel,
        out_shape=out_shape,
        grid_spec=grid_spec,
        compiler_params=pltpu.CompilerParams(
            dimension_semantics=("parallel",)),      # batch axis -> megacore on v7x
    )(ids_padded, perm_padded,
      adj_info.astype(jnp.int32), adj_answer.astype(jnp.int32))

    return out_info[:B, :S], out_ans[:B, :S]


if __name__ == "__main__":
    key = jax.random.PRNGKey(0)

    # Small deterministic synthetic "checkpoint" (no file loading).
    N, Y = 32, 128          # adj_info.shape = (num nodes, padded neighbor-list len)
    B = 12                  # number of query ids (non-multiple of tile -> exercises padding)
    num_samples = 50        # non-multiple of 128 -> exercises lane padding

    k_adj, k_ans, k_ids, k_perm = jax.random.split(key, 4)
    adj_info = jax.random.randint(k_adj, (N, Y), 0, N, dtype=jnp.int32)
    adj_answer = jax.random.randint(k_ans, (N, Y), 0, 1000, dtype=jnp.int32)

    # id2idx: raw external node id -> row index in the adjacency tables.
    raw_ids = jnp.arange(100, 100 + N, dtype=jnp.int32)
    id2idx = {int(r): i for i, r in enumerate(raw_ids)}

    ids = jax.random.choice(k_ids, raw_ids, (B,), replace=True)
    # Host glue: the dict lookup (np list-comprehension in the torch module) stays on host.
    ids_idx = jnp.array([id2idx[int(i)] for i in ids], dtype=jnp.int32)

    # torch.randperm(Y)[:num_samples] equivalent, deterministic.
    perm = jax.random.permutation(k_perm, Y)[:num_samples].astype(jnp.int32)
    # TODO(synk): torch uses int64 (long) ids; kernel uses int32 (TPU-native) and the
    #             column-gather matmul is exact only for values < 2^24.

    adj_lists, adj_answer_lists = uniform_neighbor_sampler(
        ids_idx, perm, adj_info, adj_answer)
    jax.block_until_ready((adj_lists, adj_answer_lists))

    # Pure-JAX reference check of the gather semantics.
    ref_info = adj_info[ids_idx][:, perm]
    ref_ans = adj_answer[ids_idx][:, perm]
    assert adj_lists.shape == (B, num_samples)
    assert adj_answer_lists.shape == (B, num_samples)
    assert jnp.array_equal(adj_lists, ref_info)
    assert jnp.array_equal(adj_answer_lists, ref_ans)

    print("KERNEL_OK")
</pallas_src>

<mosaic_0001>
module attributes {stable_mosaic.version = 11 : i64} {
  func.func @_sampler_kernel(%arg0: i32, %arg1: memref<16xi32, #tpu.memory_space<smem>>, %arg2: memref<1x128xi32, #tpu.memory_space<vmem>>, %arg3: memref<32x128xi32, #tpu.memory_space<any>>, %arg4: memref<32x128xi32, #tpu.memory_space<any>>, %arg5: memref<8x128xi32, #tpu.memory_space<vmem>>, %arg6: memref<8x128xi32, #tpu.memory_space<vmem>>, %arg7: memref<16x128xi32, #tpu.memory_space<vmem>>, %arg8: memref<16x!tpu.dma_semaphore, #tpu.memory_space<semaphore_mem>>) attributes {dimension_semantics = [#tpu.dimension_semantics<parallel>], iteration_bounds = array<i64: 2>, scalar_prefetch = 1 : i64, scratch_operands = 2 : i64, tpu.core_type = #tpu.core_type<tc>, window_params = [{pipeline_mode = #tpu.pipeline_mode<synchronous>, transform_indices = @transform_0, window_bounds = array<i64: 1, 128>}, {}, {}, {transform_indices = @transform_3, window_bounds = array<i64: 8, 128>}, {transform_indices = @transform_4, window_bounds = array<i64: 8, 128>}]} {
    %c8_i32 = arith.constant 8 : i32
    %0 = arith.muli %arg0, %c8_i32 : i32
    %c0_i32 = arith.constant 0 : i32
    %1 = arith.addi %0, %c0_i32 : i32
    %2 = arith.index_cast %1 : i32 to index
    %3 = memref.load %arg1[%2] : memref<16xi32, #tpu.memory_space<smem>>
    %c0_i32_0 = arith.constant 0 : i32
    %c0_i32_1 = arith.constant 0 : i32
    %4 = tpu.memref_slice %arg3[%3, %c0_i32_1] : memref<32x128xi32, #tpu.memory_space<any>> -> memref<1x128xi32, #tpu.memory_space<any>>
    %c0_i32_2 = arith.constant 0 : i32
    %c0_i32_3 = arith.constant 0 : i32
    %5 = tpu.memref_slice %arg7[%c0_i32_2, %c0_i32_3] : memref<16x128xi32, #tpu.memory_space<vmem>> -> memref<1x128xi32, #tpu.memory_space<vmem>>
    %6 = tpu.memref_slice %arg8[%c0_i32_0] : memref<16x!tpu.dma_semaphore, #tpu.memory_space<semaphore_mem>> -> memref<1x!tpu.dma_semaphore, #tpu.memory_space<semaphore_mem>>
    %7 = tpu.memref_squeeze %6 : memref<1x!tpu.dma_semaphore, #tpu.memory_space<semaphore_mem>> -> memref<!tpu.dma_semaphore, #tpu.memory_space<semaphore_mem>>
    tpu.enqueue_dma source(%4 : memref<1x128xi32, #tpu.memory_space<any>>) target(%5 : memref<1x128xi32, #tpu.memory_space<vmem>>) target_semaphore(%7 : memref<!tpu.dma_semaphore, #tpu.memory_space<semaphore_mem>>)
    %c8_i32_4 = arith.constant 8 : i32
    %c0_i32_5 = arith.constant 0 : i32
    %8 = tpu.memref_slice %arg4[%3, %c0_i32_5] : memref<32x128xi32, #tpu.memory_space<any>> -> memref<1x128xi32, #tpu.memory_space<any>>
    %c8_i32_6 = arith.constant 8 : i32
    %c0_i32_7 = arith.constant 0 : i32
    %9 = tpu.memref_slice %arg7[%c8_i32_6, %c0_i32_7] : memref<16x128xi32, #tpu.memory_space<vmem>> -> memref<1x128xi32, #tpu.memory_space<vmem>>
    %10 = tpu.memref_slice %arg8[%c8_i32_4] : memref<16x!tpu.dma_semaphore, #tpu.memory_space<semaphore_mem>> -> memref<1x!tpu.dma_semaphore, #tpu.memory_space<semaphore_mem>>
    %11 = tpu.memref_squeeze %10 : memref<1x!tpu.dma_semaphore, #tpu.memory_space<semaphore_mem>> -> memref<!tpu.dma_semaphore, #tpu.memory_space<semaphore_mem>>
    tpu.enqueue_dma source(%8 : memref<1x128xi32, #tpu.memory_space<any>>) target(%9 : memref<1x128xi32, #tpu.memory_space<vmem>>) target_semaphore(%11 : memref<!tpu.dma_semaphore, #tpu.memory_space<semaphore_mem>>)
    %c1_i32 = arith.constant 1 : i32
    %12 = arith.addi %0, %c1_i32 : i32
    %13 = arith.index_cast %12 : i32 to index
    %14 = memref.load %arg1[%13] : memref<16xi32, #tpu.memory_space<smem>>
    %c1_i32_8 = arith.constant 1 : i32
    %c0_i32_9 = arith.constant 0 : i32
    %15 = tpu.memref_slice %arg3[%14, %c0_i32_9] : memref<32x128xi32, #tpu.memory_space<any>> -> memref<1x128xi32, #tpu.memory_space<any>>
    %c1_i32_10 = arith.constant 1 : i32
    %c0_i32_11 = arith.constant 0 : i32
    %16 = tpu.memref_slice %arg7[%c1_i32_10, %c0_i32_11] : memref<16x128xi32, #tpu.memory_space<vmem>> -> memref<1x128xi32, #tpu.memory_space<vmem>>
    %17 = tpu.memref_slice %arg8[%c1_i32_8] : memref<16x!tpu.dma_semaphore, #tpu.memory_space<semaphore_mem>> -> memref<1x!tpu.dma_semaphore, #tpu.memory_space<semaphore_mem>>
    %18 = tpu.memref_squeeze %17 : memref<1x!tpu.dma_semaphore, #tpu.memory_space<semaphore_mem>> -> memref<!tpu.dma_semaphore, #tpu.memory_space<semaphore_mem>>
    tpu.enqueue_dma source(%15 : memref<1x128xi32, #tpu.memory_space<any>>) target(%16 : memref<1x128xi32, #tpu.memory_space<vmem>>) target_semaphore(%18 : memref<!tpu.dma_semaphore, #tpu.memory_space<semaphore_mem>>)
    %c9_i32 = arith.constant 9 : i32
    %c0_i32_12 = arith.constant 0 : i32
    %19 = tpu.memref_slice %arg4[%14, %c0_i32_12] : memref<32x128xi32, #tpu.memory_space<any>> -> memref<1x128xi32, #tpu.memory_space<any>>
    %c9_i32_13 = arith.constant 9 : i32
    %c0_i32_14 = arith.constant 0 : i32
    %20 = tpu.memref_slice %arg7[%c9_i32_13, %c0_i32_14] : memref<16x128xi32, #tpu.memory_space<vmem>> -> memref<1x128xi32, #tpu.memory_space<vmem>>
    %21 = tpu.memref_slice %arg8[%c9_i32] : memref<16x!tpu.dma_semaphore, #tpu.memory_space<semaphore_mem>> -> memref<1x!tpu.dma_semaphore, #tpu.memory_space<semaphore_mem>>
    %22 = tpu.memref_squeeze %21 : memref<1x!tpu.dma_semaphore, #tpu.memory_space<semaphore_mem>> -> memref<!tpu.dma_semaphore, #tpu.memory_space<semaphore_mem>>
    tpu.enqueue_dma source(%19 : memref<1x128xi32, #tpu.memory_space<any>>) target(%20 : memref<1x128xi32, #tpu.memory_space<vmem>>) target_semaphore(%22 : memref<!tpu.dma_semaphore, #tpu.memory_space<semaphore_mem>>)
    %c2_i32 = arith.constant 2 : i32
    %23 = arith.addi %0, %c2_i32 : i32
    %24 = arith.index_cast %23 : i32 to index
    %25 = memref.load %arg1[%24] : memref<16xi32, #tpu.memory_space<smem>>
    %c2_i32_15 = arith.constant 2 : i32
    %c0_i32_16 = arith.constant 0 : i32
    %26 = tpu.memref_slice %arg3[%25, %c0_i32_16] : memref<32x128xi32, #tpu.memory_space<any>> -> memref<1x128xi32, #tpu.memory_space<any>>
    %c2_i32_17 = arith.constant 2 : i32
    %c0_i32_18 = arith.constant 0 : i32
    %27 = tpu.memref_slice %arg7[%c2_i32_17, %c0_i32_18] : memref<16x128xi32, #tpu.memory_space<vmem>> -> memref<1x128xi32, #tpu.memory_space<vmem>>
    %28 = tpu.memref_slice %arg8[%c2_i32_15] : memref<16x!tpu.dma_semaphore, #tpu.memory_space<semaphore_mem>> -> memref<1x!tpu.dma_semaphore, #tpu.memory_space<semaphore_mem>>
    %29 = tpu.memref_squeeze %28 : memref<1x!tpu.dma_semaphore, #tpu.memory_space<semaphore_mem>> -> memref<!tpu.dma_semaphore, #tpu.memory_space<semaphore_mem>>
    tpu.enqueue_dma source(%26 : memref<1x128xi32, #tpu.memory_space<any>>) target(%27 : memref<1x128xi32, #tpu.memory_space<vmem>>) target_semaphore(%29 : memref<!tpu.dma_semaphore, #tpu.memory_space<semaphore_mem>>)
    %c10_i32 = arith.constant 10 : i32
    %c0_i32_19 = arith.constant 0 : i32
    %30 = tpu.memref_slice %arg4[%25, %c0_i32_19] : memref<32x128xi32, #tpu.memory_space<any>> -> memref<1x128xi32, #tpu.memory_space<any>>
    %c10_i32_20 = arith.constant 10 : i32
    %c0_i32_21 = arith.constant 0 : i32
    %31 = tpu.memref_slice %arg7[%c10_i32_20, %c0_i32_21] : memref<16x128xi32, #tpu.memory_space<vmem>> -> memref<1x128xi32, #tpu.memory_space<vmem>>
    %32 = tpu.memref_slice %arg8[%c10_i32] : memref<16x!tpu.dma_semaphore, #tpu.memory_space<semaphore_mem>> -> memref<1x!tpu.dma_semaphore, #tpu.memory_space<semaphore_mem>>
    %33 = tpu.memref_squeeze %32 : memref<1x!tpu.dma_semaphore, #tpu.memory_space<semaphore_mem>> -> memref<!tpu.dma_semaphore, #tpu.memory_space<semaphore_mem>>
    tpu.enqueue_dma source(%30 : memref<1x128xi32, #tpu.memory_space<any>>) target(%31 : memref<1x128xi32, #tpu.memory_space<vmem>>) target_semaphore(%33 : memref<!tpu.dma_semaphore, #tpu.memory_space<semaphore_mem>>)
    %c3_i32 = arith.constant 3 : i32
    %34 = arith.addi %0, %c3_i32 : i32
    %35 = arith.index_cast %34 : i32 to index
    %36 = memref.load %arg1[%35] : memref<16xi32, #tpu.memory_space<smem>>
    %c3_i32_22 = arith.constant 3 : i32
    %c0_i32_23 = arith.constant 0 : i32
    %37 = tpu.memref_slice %arg3[%36, %c0_i32_23] : memref<32x128xi32, #tpu.memory_space<any>> -> memref<1x128xi32, #tpu.memory_space<any>>
    %c3_i32_24 = arith.constant 3 : i32
    %c0_i32_25 = arith.constant 0 : i32
    %38 = tpu.memref_slice %arg7[%c3_i32_24, %c0_i32_25] : memref<16x128xi32, #tpu.memory_space<vmem>> -> memref<1x128xi32, #tpu.memory_space<vmem>>
    %39 = tpu.memref_slice %arg8[%c3_i32_22] : memref<16x!tpu.dma_semaphore, #tpu.memory_space<semaphore_mem>> -> memref<1x!tpu.dma_semaphore, #tpu.memory_space<semaphore_mem>>
    %40 = tpu.memref_squeeze %39 : memref<1x!tpu.dma_semaphore, #tpu.memory_space<semaphore_mem>> -> memref<!tpu.dma_semaphore, #tpu.memory_space<semaphore_mem>>
    tpu.enqueue_dma source(%37 : memref<1x128xi32, #tpu.memory_space<any>>) target(%38 : memref<1x128xi32, #tpu.memory_space<vmem>>) target_semaphore(%40 : memref<!tpu.dma_semaphore, #tpu.memory_space<semaphore_mem>>)
    %c11_i32 = arith.constant 11 : i32
    %c0_i32_26 = arith.constant 0 : i32
    %41 = tpu.memref_slice %arg4[%36, %c0_i32_26] : memref<32x128xi32, #tpu.memory_space<any>> -> memref<1x128xi32, #tpu.memory_space<any>>
    %c11_i32_27 = arith.constant 11 : i32
    %c0_i32_28 = arith.constant 0 : i32
    %42 = tpu.memref_slice %arg7[%c11_i32_27, %c0_i32_28] : memref<16x128xi32, #tpu.memory_space<vmem>> -> memref<1x128xi32, #tpu.memory_space<vmem>>
    %43 = tpu.memref_slice %arg8[%c11_i32] : memref<16x!tpu.dma_semaphore, #tpu.memory_space<semaphore_mem>> -> memref<1x!tpu.dma_semaphore, #tpu.memory_space<semaphore_mem>>
    %44 = tpu.memref_squeeze %43 : memref<1x!tpu.dma_semaphore, #tpu.memory_space<semaphore_mem>> -> memref<!tpu.dma_semaphore, #tpu.memory_space<semaphore_mem>>
    tpu.enqueue_dma source(%41 : memref<1x128xi32, #tpu.memory_space<any>>) target(%42 : memref<1x128xi32, #tpu.memory_space<vmem>>) target_semaphore(%44 : memref<!tpu.dma_semaphore, #tpu.memory_space<semaphore_mem>>)
    %c4_i32 = arith.constant 4 : i32
    %45 = arith.addi %0, %c4_i32 : i32
    %46 = arith.index_cast %45 : i32 to index
    %47 = memref.load %arg1[%46] : memref<16xi32, #tpu.memory_space<smem>>
    %c4_i32_29 = arith.constant 4 : i32
    %c0_i32_30 = arith.constant 0 : i32
    %48 = tpu.memref_slice %arg3[%47, %c0_i32_30] : memref<32x128xi32, #tpu.memory_space<any>> -> memref<1x128xi32, #tpu.memory_space<any>>
    %c4_i32_31 = arith.constant 4 : i32
    %c0_i32_32 = arith.constant 0 : i32
    %49 = tpu.memref_slice %arg7[%c4_i32_31, %c0_i32_32] : memref<16x128xi32, #tpu.memory_space<vmem>> -> memref<1x128xi32, #tpu.memory_space<vmem>>
    %50 = tpu.memref_slice %arg8[%c4_i32_29] : memref<16x!tpu.dma_semaphore, #tpu.memory_space<semaphore_mem>> -> memref<1x!tpu.dma_semaphore, #tpu.memory_space<semaphore_mem>>
    %51 = tpu.memref_squeeze %50 : memref<1x!tpu.dma_semaphore, #tpu.memory_space<semaphore_mem>> -> memref<!tpu.dma_semaphore, #tpu.memory_space<semaphore_mem>>
    tpu.enqueue_dma source(%48 : memref<1x128xi32, #tpu.memory_space<any>>) target(%49 : memref<1x128xi32, #tpu.memory_space<vmem>>) target_semaphore(%51 : memref<!tpu.dma_semaphore, #tpu.memory_space<semaphore_mem>>)
    %c12_i32 = arith.constant 12 : i32
    %c0_i32_33 = arith.constant 0 : i32
    %52 = tpu.memref_slice %arg4[%47, %c0_i32_33] : memref<32x128xi32, #tpu.memory_space<any>> -> memref<1x128xi32, #tpu.memory_space<any>>
    %c12_i32_34 = arith.constant 12 : i32
    %c0_i32_35 = arith.constant 0 : i32
    %53 = tpu.memref_slice %arg7[%c12_i32_34, %c0_i32_35] : memref<16x128xi32, #tpu.memory_space<vmem>> -> memref<1x128xi32, #tpu.memory_space<vmem>>
    %54 = tpu.memref_slice %arg8[%c12_i32] : memref<16x!tpu.dma_semaphore, #tpu.memory_space<semaphore_mem>> -> memref<1x!tpu.dma_semaphore, #tpu.memory_space<semaphore_mem>>
    %55 = tpu.memref_squeeze %54 : memref<1x!tpu.dma_semaphore, #tpu.memory_space<semaphore_mem>> -> memref<!tpu.dma_semaphore, #tpu.memory_space<semaphore_mem>>
    tpu.enqueue_dma source(%52 : memref<1x128xi32, #tpu.memory_space<any>>) target(%53 : memref<1x128xi32, #tpu.memory_space<vmem>>) target_semaphore(%55 : memref<!tpu.dma_semaphore, #tpu.memory_space<semaphore_mem>>)
    %c5_i32 = arith.constant 5 : i32
    %56 = arith.addi %0, %c5_i32 : i32
    %57 = arith.index_cast %56 : i32 to index
    %58 = memref.load %arg1[%57] : memref<16xi32, #tpu.memory_space<smem>>
    %c5_i32_36 = arith.constant 5 : i32
    %c0_i32_37 = arith.constant 0 : i32
    %59 = tpu.memref_slice %arg3[%58, %c0_i32_37] : memref<32x128xi32, #tpu.memory_space<any>> -> memref<1x128xi32, #tpu.memory_space<any>>
    %c5_i32_38 = arith.constant 5 : i32
    %c0_i32_39 = arith.constant 0 : i32
    %60 = tpu.memref_slice %arg7[%c5_i32_38, %c0_i32_39] : memref<16x128xi32, #tpu.memory_space<vmem>> -> memref<1x128xi32, #tpu.memory_space<vmem>>
    %61 = tpu.memref_slice %arg8[%c5_i32_36] : memref<16x!tpu.dma_semaphore, #tpu.memory_space<semaphore_mem>> -> memref<1x!tpu.dma_semaphore, #tpu.memory_space<semaphore_mem>>
    %62 = tpu.memref_squeeze %61 : memref<1x!tpu.dma_semaphore, #tpu.memory_space<semaphore_mem>> -> memref<!tpu.dma_semaphore, #tpu.memory_space<semaphore_mem>>
    tpu.enqueue_dma source(%59 : memref<1x128xi32, #tpu.memory_space<any>>) target(%60 : memref<1x128xi32, #tpu.memory_space<vmem>>) target_semaphore(%62 : memref<!tpu.dma_semaphore, #tpu.memory_space<semaphore_mem>>)
    %c13_i32 = arith.constant 13 : i32
    %c0_i32_40 = arith.constant 0 : i32
    %63 = tpu.memref_slice %arg4[%58, %c0_i32_40] : memref<32x128xi32, #tpu.memory_space<any>> -> memref<1x128xi32, #tpu.memory_space<any>>
    %c13_i32_41 = arith.constant 13 : i32
    %c0_i32_42 = arith.constant 0 : i32
    %64 = tpu.memref_slice %arg7[%c13_i32_41, %c0_i32_42] : memref<16x128xi32, #tpu.memory_space<vmem>> -> memref<1x128xi32, #tpu.memory_space<vmem>>
    %65 = tpu.memref_slice %arg8[%c13_i32] : memref<16x!tpu.dma_semaphore, #tpu.memory_space<semaphore_mem>> -> memref<1x!tpu.dma_semaphore, #tpu.memory_space<semaphore_mem>>
    %66 = tpu.memref_squeeze %65 : memref<1x!tpu.dma_semaphore, #tpu.memory_space<semaphore_mem>> -> memref<!tpu.dma_semaphore, #tpu.memory_space<semaphore_mem>>
    tpu.enqueue_dma source(%63 : memref<1x128xi32, #tpu.memory_space<any>>) target(%64 : memref<1x128xi32, #tpu.memory_space<vmem>>) target_semaphore(%66 : memref<!tpu.dma_semaphore, #tpu.memory_space<semaphore_mem>>)
    %c6_i32 = arith.constant 6 : i32
    %67 = arith.addi %0, %c6_i32 : i32
    %68 = arith.index_cast %67 : i32 to index
    %69 = memref.load %arg1[%68] : memref<16xi32, #tpu.memory_space<smem>>
    %c6_i32_43 = arith.constant 6 : i32
    %c0_i32_44 = arith.constant 0 : i32
    %70 = tpu.memref_slice %arg3[%69, %c0_i32_44] : memref<32x128xi32, #tpu.memory_space<any>> -> memref<1x128xi32, #tpu.memory_space<any>>
    %c6_i32_45 = arith.constant 6 : i32
    %c0_i32_46 = arith.constant 0 : i32
    %71 = tpu.memref_slice %arg7[%c6_i32_45, %c0_i32_46] : memref<16x128xi32, #tpu.memory_space<vmem>> -> memref<1x128xi32, #tpu.memory_space<vmem>>
    %72 = tpu.memref_slice %arg8[%c6_i32_43] : memref<16x!tpu.dma_semaphore, #tpu.memory_space<semaphore_mem>> -> memref<1x!tpu.dma_semaphore, #tpu.memory_space<semaphore_mem>>
    %73 = tpu.memref_squeeze %72 : memref<1x!tpu.dma_semaphore, #tpu.memory_space<semaphore_mem>> -> memref<!tpu.dma_semaphore, #tpu.memory_space<semaphore_mem>>
    tpu.enqueue_dma source(%70 : memref<1x128xi32, #tpu.memory_space<any>>) target(%71 : memref<1x128xi32, #tpu.memory_space<vmem>>) target_semaphore(%73 : memref<!tpu.dma_semaphore, #tpu.memory_space<semaphore_mem>>)
    %c14_i32 = arith.constant 14 : i32
    %c0_i32_47 = arith.constant 0 : i32
    %74 = tpu.memref_slice %arg4[%69, %c0_i32_47] : memref<32x128xi32, #tpu.memory_space<any>> -> memref<1x128xi32, #tpu.memory_space<any>>
    %c14_i32_48 = arith.constant 14 : i32
    %c0_i32_49 = arith.constant 0 : i32
    %75 = tpu.memref_slice %arg7[%c14_i32_48, %c0_i32_49] : memref<16x128xi32, #tpu.memory_space<vmem>> -> memref<1x128xi32, #tpu.memory_space<vmem>>
    %76 = tpu.memref_slice %arg8[%c14_i32] : memref<16x!tpu.dma_semaphore, #tpu.memory_space<semaphore_mem>> -> memref<1x!tpu.dma_semaphore, #tpu.memory_space<semaphore_mem>>
    %77 = tpu.memref_squeeze %76 : memref<1x!tpu.dma_semaphore, #tpu.memory_space<semaphore_mem>> -> memref<!tpu.dma_semaphore, #tpu.memory_space<semaphore_mem>>
    tpu.enqueue_dma source(%74 : memref<1x128xi32, #tpu.memory_space<any>>) target(%75 : memref<1x128xi32, #tpu.memory_space<vmem>>) target_semaphore(%77 : memref<!tpu.dma_semaphore, #tpu.memory_space<semaphore_mem>>)
    %c7_i32 = arith.constant 7 : i32
    %78 = arith.addi %0, %c7_i32 : i32
    %79 = arith.index_cast %78 : i32 to index
    %80 = memref.load %arg1[%79] : memref<16xi32, #tpu.memory_space<smem>>
    %c7_i32_50 = arith.constant 7 : i32
    %c0_i32_51 = arith.constant 0 : i32
    %81 = tpu.memref_slice %arg3[%80, %c0_i32_51] : memref<32x128xi32, #tpu.memory_space<any>> -> memref<1x128xi32, #tpu.memory_space<any>>
    %c7_i32_52 = arith.constant 7 : i32
    %c0_i32_53 = arith.constant 0 : i32
    %82 = tpu.memref_slice %arg7[%c7_i32_52, %c0_i32_53] : memref<16x128xi32, #tpu.memory_space<vmem>> -> memref<1x128xi32, #tpu.memory_space<vmem>>
    %83 = tpu.memref_slice %arg8[%c7_i32_50] : memref<16x!tpu.dma_semaphore, #tpu.memory_space<semaphore_mem>> -> memref<1x!tpu.dma_semaphore, #tpu.memory_space<semaphore_mem>>
    %84 = tpu.memref_squeeze %83 : memref<1x!tpu.dma_semaphore, #tpu.memory_space<semaphore_mem>> -> memref<!tpu.dma_semaphore, #tpu.memory_space<semaphore_mem>>
    tpu.enqueue_dma source(%81 : memref<1x128xi32, #tpu.memory_space<any>>) target(%82 : memref<1x128xi32, #tpu.memory_space<vmem>>) target_semaphore(%84 : memref<!tpu.dma_semaphore, #tpu.memory_space<semaphore_mem>>)
    %c15_i32 = arith.constant 15 : i32
    %c0_i32_54 = arith.constant 0 : i32
    %85 = tpu.memref_slice %arg4[%80, %c0_i32_54] : memref<32x128xi32, #tpu.memory_space<any>> -> memref<1x128xi32, #tpu.memory_space<any>>
    %c15_i32_55 = arith.constant 15 : i32
    %c0_i32_56 = arith.constant 0 : i32
    %86 = tpu.memref_slice %arg7[%c15_i32_55, %c0_i32_56] : memref<16x128xi32, #tpu.memory_space<vmem>> -> memref<1x128xi32, #tpu.memory_space<vmem>>
    %87 = tpu.memref_slice %arg8[%c15_i32] : memref<16x!tpu.dma_semaphore, #tpu.memory_space<semaphore_mem>> -> memref<1x!tpu.dma_semaphore, #tpu.memory_space<semaphore_mem>>
    %88 = tpu.memref_squeeze %87 : memref<1x!tpu.dma_semaphore, #tpu.memory_space<semaphore_mem>> -> memref<!tpu.dma_semaphore, #tpu.memory_space<semaphore_mem>>
    tpu.enqueue_dma source(%85 : memref<1x128xi32, #tpu.memory_space<any>>) target(%86 : memref<1x128xi32, #tpu.memory_space<vmem>>) target_semaphore(%88 : memref<!tpu.dma_semaphore, #tpu.memory_space<semaphore_mem>>)
    %89 = tpu.iota {dimensions = array<i32: 0>} : vector<128x128xi32>
    %c0 = arith.constant 0 : index
    %c0_57 = arith.constant 0 : index
    %90 = vector.load %arg2[%c0, %c0_57] : memref<1x128xi32, #tpu.memory_space<vmem>>, vector<1x128xi32>
    %91 = vector.broadcast %90 : vector<1x128xi32> to vector<128x128xi32>
    %92 = arith.cmpi eq, %89, %91 : vector<128x128xi32>
    %93 = arith.extui %92 : vector<128x128xi1> to vector<128x128xi32>
    %94 = arith.sitofp %93 : vector<128x128xi32> to vector<128x128xf32>
    %c0_i32_58 = arith.constant 0 : i32
    %c0_i32_59 = arith.constant 0 : i32
    %95 = tpu.memref_slice %arg3[%3, %c0_i32_59] : memref<32x128xi32, #tpu.memory_space<any>> -> memref<1x128xi32, #tpu.memory_space<any>>
    %c0_i32_60 = arith.constant 0 : i32
    %c0_i32_61 = arith.constant 0 : i32
    %96 = tpu.memref_slice %arg7[%c0_i32_60, %c0_i32_61] : memref<16x128xi32, #tpu.memory_space<vmem>> -> memref<1x128xi32, #tpu.memory_space<vmem>>
    %97 = tpu.memref_slice %arg8[%c0_i32_58] : memref<16x!tpu.dma_semaphore, #tpu.memory_space<semaphore_mem>> -> memref<1x!tpu.dma_semaphore, #tpu.memory_space<semaphore_mem>>
    %98 = tpu.memref_squeeze %97 : memref<1x!tpu.dma_semaphore, #tpu.memory_space<semaphore_mem>> -> memref<!tpu.dma_semaphore, #tpu.memory_space<semaphore_mem>>
    tpu.wait_dma2 semaphore(%98 : memref<!tpu.dma_semaphore, #tpu.memory_space<semaphore_mem>>) src(%95 : memref<1x128xi32, #tpu.memory_space<any>>) dst(%96 : memref<1x128xi32, #tpu.memory_space<vmem>>)
    %c8_i32_62 = arith.constant 8 : i32
    %c0_i32_63 = arith.constant 0 : i32
    %99 = tpu.memref_slice %arg4[%3, %c0_i32_63] : memref<32x128xi32, #tpu.memory_space<any>> -> memref<1x128xi32, #tpu.memory_space<any>>
    %c8_i32_64 = arith.constant 8 : i32
    %c0_i32_65 = arith.constant 0 : i32
    %100 = tpu.memref_slice %arg7[%c8_i32_64, %c0_i32_65] : memref<16x128xi32, #tpu.memory_space<vmem>> -> memref<1x128xi32, #tpu.memory_space<vmem>>
    %101 = tpu.memref_slice %arg8[%c8_i32_62] : memref<16x!tpu.dma_semaphore, #tpu.memory_space<semaphore_mem>> -> memref<1x!tpu.dma_semaphore, #tpu.memory_space<semaphore_mem>>
    %102 = tpu.memref_squeeze %101 : memref<1x!tpu.dma_semaphore, #tpu.memory_space<semaphore_mem>> -> memref<!tpu.dma_semaphore, #tpu.memory_space<semaphore_mem>>
    tpu.wait_dma2 semaphore(%102 : memref<!tpu.dma_semaphore, #tpu.memory_space<semaphore_mem>>) src(%99 : memref<1x128xi32, #tpu.memory_space<any>>) dst(%100 : memref<1x128xi32, #tpu.memory_space<vmem>>)
    %c1_i32_66 = arith.constant 1 : i32
    %c0_i32_67 = arith.constant 0 : i32
    %103 = tpu.memref_slice %arg3[%14, %c0_i32_67] : memref<32x128xi32, #tpu.memory_space<any>> -> memref<1x128xi32, #tpu.memory_space<any>>
    %c1_i32_68 = arith.constant 1 : i32
    %c0_i32_69 = arith.constant 0 : i32
    %104 = tpu.memref_slice %arg7[%c1_i32_68, %c0_i32_69] : memref<16x128xi32, #tpu.memory_space<vmem>> -> memref<1x128xi32, #tpu.memory_space<vmem>>
    %105 = tpu.memref_slice %arg8[%c1_i32_66] : memref<16x!tpu.dma_semaphore, #tpu.memory_space<semaphore_mem>> -> memref<1x!tpu.dma_semaphore, #tpu.memory_space<semaphore_mem>>
    %106 = tpu.memref_squeeze %105 : memref<1x!tpu.dma_semaphore, #tpu.memory_space<semaphore_mem>> -> memref<!tpu.dma_semaphore, #tpu.memory_space<semaphore_mem>>
    tpu.wait_dma2 semaphore(%106 : memref<!tpu.dma_semaphore, #tpu.memory_space<semaphore_mem>>) src(%103 : memref<1x128xi32, #tpu.memory_space<any>>) dst(%104 : memref<1x128xi32, #tpu.memory_space<vmem>>)
    %c9_i32_70 = arith.constant 9 : i32
    %c0_i32_71 = arith.constant 0 : i32
    %107 = tpu.memref_slice %arg4[%14, %c0_i32_71] : memref<32x128xi32, #tpu.memory_space<any>> -> memref<1x128xi32, #tpu.memory_space<any>>
    %c9_i32_72 = arith.constant 9 : i32
    %c0_i32_73 = arith.constant 0 : i32
    %108 = tpu.memref_slice %arg7[%c9_i32_72, %c0_i32_73] : memref<16x128xi32, #tpu.memory_space<vmem>> -> memref<1x128xi32, #tpu.memory_space<vmem>>
    %109 = tpu.memref_slice %arg8[%c9_i32_70] : memref<16x!tpu.dma_semaphore, #tpu.memory_space<semaphore_mem>> -> memref<1x!tpu.dma_semaphore, #tpu.memory_space<semaphore_mem>>
    %110 = tpu.memref_squeeze %109 : memref<1x!tpu.dma_semaphore, #tpu.memory_space<semaphore_mem>> -> memref<!tpu.dma_semaphore, #tpu.memory_space<semaphore_mem>>
    tpu.wait_dma2 semaphore(%110 : memref<!tpu.dma_semaphore, #tpu.memory_space<semaphore_mem>>) src(%107 : memref<1x128xi32, #tpu.memory_space<any>>) dst(%108 : memref<1x128xi32, #tpu.memory_space<vmem>>)
    %c2_i32_74 = arith.constant 2 : i32
    %c0_i32_75 = arith.constant 0 : i32
    %111 = tpu.memref_slice %arg3[%25, %c0_i32_75] : memref<32x128xi32, #tpu.memory_space<any>> -> memref<1x128xi32, #tpu.memory_space<any>>
    %c2_i32_76 = arith.constant 2 : i32
    %c0_i32_77 = arith.constant 0 : i32
    %112 = tpu.memref_slice %arg7[%c2_i32_76, %c0_i32_77] : memref<16x128xi32, #tpu.memory_space<vmem>> -> memref<1x128xi32, #tpu.memory_space<vmem>>
    %113 = tpu.memref_slice %arg8[%c2_i32_74] : memref<16x!tpu.dma_semaphore, #tpu.memory_space<semaphore_mem>> -> memref<1x!tpu.dma_semaphore, #tpu.memory_space<semaphore_mem>>
    %114 = tpu.memref_squeeze %113 : memref<1x!tpu.dma_semaphore, #tpu.memory_space<semaphore_mem>> -> memref<!tpu.dma_semaphore, #tpu.memory_space<semaphore_mem>>
    tpu.wait_dma2 semaphore(%114 : memref<!tpu.dma_semaphore, #tpu.memory_space<semaphore_mem>>) src(%111 : memref<1x128xi32, #tpu.memory_space<any>>) dst(%112 : memref<1x128xi32, #tpu.memory_space<vmem>>)
    %c10_i32_78 = arith.constant 10 : i32
    %c0_i32_79 = arith.constant 0 : i32
    %115 = tpu.memref_slice %arg4[%25, %c0_i32_79] : memref<32x128xi32, #tpu.memory_space<any>> -> memref<1x128xi32, #tpu.memory_space<any>>
    %c10_i32_80 = arith.constant 10 : i32
    %c0_i32_81 = arith.constant 0 : i32
    %116 = tpu.memref_slice %arg7[%c10_i32_80, %c0_i32_81] : memref<16x128xi32, #tpu.memory_space<vmem>> -> memref<1x128xi32, #tpu.memory_space<vmem>>
    %117 = tpu.memref_slice %arg8[%c10_i32_78] : memref<16x!tpu.dma_semaphore, #tpu.memory_space<semaphore_mem>> -> memref<1x!tpu.dma_semaphore, #tpu.memory_space<semaphore_mem>>
    %118 = tpu.memref_squeeze %117 : memref<1x!tpu.dma_semaphore, #tpu.memory_space<semaphore_mem>> -> memref<!tpu.dma_semaphore, #tpu.memory_space<semaphore_mem>>
    tpu.wait_dma2 semaphore(%118 : memref<!tpu.dma_semaphore, #tpu.memory_space<semaphore_mem>>) src(%115 : memref<1x128xi32, #tpu.memory_space<any>>) dst(%116 : memref<1x128xi32, #tpu.memory_space<vmem>>)
    %c3_i32_82 = arith.constant 3 : i32
    %c0_i32_83 = arith.constant 0 : i32
    %119 = tpu.memref_slice %arg3[%36, %c0_i32_83] : memref<32x128xi32, #tpu.memory_space<any>> -> memref<1x128xi32, #tpu.memory_space<any>>
    %c3_i32_84 = arith.constant 3 : i32
    %c0_i32_85 = arith.constant 0 : i32
    %120 = tpu.memref_slice %arg7[%c3_i32_84, %c0_i32_85] : memref<16x128xi32, #tpu.memory_space<vmem>> -> memref<1x128xi32, #tpu.memory_space<vmem>>
    %121 = tpu.memref_slice %arg8[%c3_i32_82] : memref<16x!tpu.dma_semaphore, #tpu.memory_space<semaphore_mem>> -> memref<1x!tpu.dma_semaphore, #tpu.memory_space<semaphore_mem>>
    %122 = tpu.memref_squeeze %121 : memref<1x!tpu.dma_semaphore, #tpu.memory_space<semaphore_mem>> -> memref<!tpu.dma_semaphore, #tpu.memory_space<semaphore_mem>>
    tpu.wait_dma2 semaphore(%122 : memref<!tpu.dma_semaphore, #tpu.memory_space<semaphore_mem>>) src(%119 : memref<1x128xi32, #tpu.memory_space<any>>) dst(%120 : memref<1x128xi32, #tpu.memory_space<vmem>>)
    %c11_i32_86 = arith.constant 11 : i32
    %c0_i32_87 = arith.constant 0 : i32
    %123 = tpu.memref_slice %arg4[%36, %c0_i32_87] : memref<32x128xi32, #tpu.memory_space<any>> -> memref<1x128xi32, #tpu.memory_space<any>>
    %c11_i32_88 = arith.constant 11 : i32
    %c0_i32_89 = arith.constant 0 : i32
    %124 = tpu.memref_slice %arg7[%c11_i32_88, %c0_i32_89] : memref<16x128xi32, #tpu.memory_space<vmem>> -> memref<1x128xi32, #tpu.memory_space<vmem>>
    %125 = tpu.memref_slice %arg8[%c11_i32_86] : memref<16x!tpu.dma_semaphore, #tpu.memory_space<semaphore_mem>> -> memref<1x!tpu.dma_semaphore, #tpu.memory_space<semaphore_mem>>
    %126 = tpu.memref_squeeze %125 : memref<1x!tpu.dma_semaphore, #tpu.memory_space<semaphore_mem>> -> memref<!tpu.dma_semaphore, #tpu.memory_space<semaphore_mem>>
    tpu.wait_dma2 semaphore(%126 : memref<!tpu.dma_semaphore, #tpu.memory_space<semaphore_mem>>) src(%123 : memref<1x128xi32, #tpu.memory_space<any>>) dst(%124 : memref<1x128xi32, #tpu.memory_space<vmem>>)
    %c4_i32_90 = arith.constant 4 : i32
    %c0_i32_91 = arith.constant 0 : i32
    %127 = tpu.memref_slice %arg3[%47, %c0_i32_91] : memref<32x128xi32, #tpu.memory_space<any>> -> memref<1x128xi32, #tpu.memory_space<any>>
    %c4_i32_92 = arith.constant 4 : i32
    %c0_i32_93 = arith.constant 0 : i32
    %128 = tpu.memref_slice %arg7[%c4_i32_92, %c0_i32_93] : memref<16x128xi32, #tpu.memory_space<vmem>> -> memref<1x128xi32, #tpu.memory_space<vmem>>
    %129 = tpu.memref_slice %arg8[%c4_i32_90] : memref<16x!tpu.dma_semaphore, #tpu.memory_space<semaphore_mem>> -> memref<1x!tpu.dma_semaphore, #tpu.memory_space<semaphore_mem>>
    %130 = tpu.memref_squeeze %129 : memref<1x!tpu.dma_semaphore, #tpu.memory_space<semaphore_mem>> -> memref<!tpu.dma_semaphore, #tpu.memory_space<semaphore_mem>>
    tpu.wait_dma2 semaphore(%130 : memref<!tpu.dma_semaphore, #tpu.memory_space<semaphore_mem>>) src(%127 : memref<1x128xi32, #tpu.memory_space<any>>) dst(%128 : memref<1x128xi32, #tpu.memory_space<vmem>>)
    %c12_i32_94 = arith.constant 12 : i32
    %c0_i32_95 = arith.constant 0 : i32
    %131 = tpu.memref_slice %arg4[%47, %c0_i32_95] : memref<32x128xi32, #tpu.memory_space<any>> -> memref<1x128xi32, #tpu.memory_space<any>>
    %c12_i32_96 = arith.constant 12 : i32
    %c0_i32_97 = arith.constant 0 : i32
    %132 = tpu.memref_slice %arg7[%c12_i32_96, %c0_i32_97] : memref<16x128xi32, #tpu.memory_space<vmem>> -> memref<1x128xi32, #tpu.memory_space<vmem>>
    %133 = tpu.memref_slice %arg8[%c12_i32_94] : memref<16x!tpu.dma_semaphore, #tpu.memory_space<semaphore_mem>> -> memref<1x!tpu.dma_semaphore, #tpu.memory_space<semaphore_mem>>
    %134 = tpu.memref_squeeze %133 : memref<1x!tpu.dma_semaphore, #tpu.memory_space<semaphore_mem>> -> memref<!tpu.dma_semaphore, #tpu.memory_space<semaphore_mem>>
    tpu.wait_dma2 semaphore(%134 : memref<!tpu.dma_semaphore, #tpu.memory_space<semaphore_mem>>) src(%131 : memref<1x128xi32, #tpu.memory_space<any>>) dst(%132 : memref<1x128xi32, #tpu.memory_space<vmem>>)
    %c5_i32_98 = arith.constant 5 : i32
    %c0_i32_99 = arith.constant 0 : i32
    %135 = tpu.memref_slice %arg3[%58, %c0_i32_99] : memref<32x128xi32, #tpu.memory_space<any>> -> memref<1x128xi32, #tpu.memory_space<any>>
    %c5_i32_100 = arith.constant 5 : i32
    %c0_i32_101 = arith.constant 0 : i32
    %136 = tpu.memref_slice %arg7[%c5_i32_100, %c0_i32_101] : memref<16x128xi32, #tpu.memory_space<vmem>> -> memref<1x128xi32, #tpu.memory_space<vmem>>
    %137 = tpu.memref_slice %arg8[%c5_i32_98] : memref<16x!tpu.dma_semaphore, #tpu.memory_space<semaphore_mem>> -> memref<1x!tpu.dma_semaphore, #tpu.memory_space<semaphore_mem>>
    %138 = tpu.memref_squeeze %137 : memref<1x!tpu.dma_semaphore, #tpu.memory_space<semaphore_mem>> -> memref<!tpu.dma_semaphore, #tpu.memory_space<semaphore_mem>>
    tpu.wait_dma2 semaphore(%138 : memref<!tpu.dma_semaphore, #tpu.memory_space<semaphore_mem>>) src(%135 : memref<1x128xi32, #tpu.memory_space<any>>) dst(%136 : memref<1x128xi32, #tpu.memory_space<vmem>>)
    %c13_i32_102 = arith.constant 13 : i32
    %c0_i32_103 = arith.constant 0 : i32
    %139 = tpu.memref_slice %arg4[%58, %c0_i32_103] : memref<32x128xi32, #tpu.memory_space<any>> -> memref<1x128xi32, #tpu.memory_space<any>>
    %c13_i32_104 = arith.constant 13 : i32
    %c0_i32_105 = arith.constant 0 : i32
    %140 = tpu.memref_slice %arg7[%c13_i32_104, %c0_i32_105] : memref<16x128xi32, #tpu.memory_space<vmem>> -> memref<1x128xi32, #tpu.memory_space<vmem>>
    %141 = tpu.memref_slice %arg8[%c13_i32_102] : memref<16x!tpu.dma_semaphore, #tpu.memory_space<semaphore_mem>> -> memref<1x!tpu.dma_semaphore, #tpu.memory_space<semaphore_mem>>
    %142 = tpu.memref_squeeze %141 : memref<1x!tpu.dma_semaphore, #tpu.memory_space<semaphore_mem>> -> memref<!tpu.dma_semaphore, #tpu.memory_space<semaphore_mem>>
    tpu.wait_dma2 semaphore(%142 : memref<!tpu.dma_semaphore, #tpu.memory_space<semaphore_mem>>) src(%139 : memref<1x128xi32, #tpu.memory_space<any>>) dst(%140 : memref<1x128xi32, #tpu.memory_space<vmem>>)
    %c6_i32_106 = arith.constant 6 : i32
    %c0_i32_107 = arith.constant 0 : i32
    %143 = tpu.memref_slice %arg3[%69, %c0_i32_107] : memref<32x128xi32, #tpu.memory_space<any>> -> memref<1x128xi32, #tpu.memory_space<any>>
    %c6_i32_108 = arith.constant 6 : i32
    %c0_i32_109 = arith.constant 0 : i32
    %144 = tpu.memref_slice %arg7[%c6_i32_108, %c0_i32_109] : memref<16x128xi32, #tpu.memory_space<vmem>> -> memref<1x128xi32, #tpu.memory_space<vmem>>
    %145 = tpu.memref_slice %arg8[%c6_i32_106] : memref<16x!tpu.dma_semaphore, #tpu.memory_space<semaphore_mem>> -> memref<1x!tpu.dma_semaphore, #tpu.memory_space<semaphore_mem>>
    %146 = tpu.memref_squeeze %145 : memref<1x!tpu.dma_semaphore, #tpu.memory_space<semaphore_mem>> -> memref<!tpu.dma_semaphore, #tpu.memory_space<semaphore_mem>>
    tpu.wait_dma2 semaphore(%146 : memref<!tpu.dma_semaphore, #tpu.memory_space<semaphore_mem>>) src(%143 : memref<1x128xi32, #tpu.memory_space<any>>) dst(%144 : memref<1x128xi32, #tpu.memory_space<vmem>>)
    %c14_i32_110 = arith.constant 14 : i32
    %c0_i32_111 = arith.constant 0 : i32
    %147 = tpu.memref_slice %arg4[%69, %c0_i32_111] : memref<32x128xi32, #tpu.memory_space<any>> -> memref<1x128xi32, #tpu.memory_space<any>>
    %c14_i32_112 = arith.constant 14 : i32
    %c0_i32_113 = arith.constant 0 : i32
    %148 = tpu.memref_slice %arg7[%c14_i32_112, %c0_i32_113] : memref<16x128xi32, #tpu.memory_space<vmem>> -> memref<1x128xi32, #tpu.memory_space<vmem>>
    %149 = tpu.memref_slice %arg8[%c14_i32_110] : memref<16x!tpu.dma_semaphore, #tpu.memory_space<semaphore_mem>> -> memref<1x!tpu.dma_semaphore, #tpu.memory_space<semaphore_mem>>
    %150 = tpu.memref_squeeze %149 : memref<1x!tpu.dma_semaphore, #tpu.memory_space<semaphore_mem>> -> memref<!tpu.dma_semaphore, #tpu.memory_space<semaphore_mem>>
    tpu.wait_dma2 semaphore(%150 : memref<!tpu.dma_semaphore, #tpu.memory_space<semaphore_mem>>) src(%147 : memref<1x128xi32, #tpu.memory_space<any>>) dst(%148 : memref<1x128xi32, #tpu.memory_space<vmem>>)
    %c7_i32_114 = arith.constant 7 : i32
    %c0_i32_115 = arith.constant 0 : i32
    %151 = tpu.memref_slice %arg3[%80, %c0_i32_115] : memref<32x128xi32, #tpu.memory_space<any>> -> memref<1x128xi32, #tpu.memory_space<any>>
    %c7_i32_116 = arith.constant 7 : i32
    %c0_i32_117 = arith.constant 0 : i32
    %152 = tpu.memref_slice %arg7[%c7_i32_116, %c0_i32_117] : memref<16x128xi32, #tpu.memory_space<vmem>> -> memref<1x128xi32, #tpu.memory_space<vmem>>
    %153 = tpu.memref_slice %arg8[%c7_i32_114] : memref<16x!tpu.dma_semaphore, #tpu.memory_space<semaphore_mem>> -> memref<1x!tpu.dma_semaphore, #tpu.memory_space<semaphore_mem>>
    %154 = tpu.memref_squeeze %153 : memref<1x!tpu.dma_semaphore, #tpu.memory_space<semaphore_mem>> -> memref<!tpu.dma_semaphore, #tpu.memory_space<semaphore_mem>>
    tpu.wait_dma2 semaphore(%154 : memref<!tpu.dma_semaphore, #tpu.memory_space<semaphore_mem>>) src(%151 : memref<1x128xi32, #tpu.memory_space<any>>) dst(%152 : memref<1x128xi32, #tpu.memory_space<vmem>>)
    %c15_i32_118 = arith.constant 15 : i32
    %c0_i32_119 = arith.constant 0 : i32
    %155 = tpu.memref_slice %arg4[%80, %c0_i32_119] : memref<32x128xi32, #tpu.memory_space<any>> -> memref<1x128xi32, #tpu.memory_space<any>>
    %c15_i32_120 = arith.constant 15 : i32
    %c0_i32_121 = arith.constant 0 : i32
    %156 = tpu.memref_slice %arg7[%c15_i32_120, %c0_i32_121] : memref<16x128xi32, #tpu.memory_space<vmem>> -> memref<1x128xi32, #tpu.memory_space<vmem>>
    %157 = tpu.memref_slice %arg8[%c15_i32_118] : memref<16x!tpu.dma_semaphore, #tpu.memory_space<semaphore_mem>> -> memref<1x!tpu.dma_semaphore, #tpu.memory_space<semaphore_mem>>
    %158 = tpu.memref_squeeze %157 : memref<1x!tpu.dma_semaphore, #tpu.memory_space<semaphore_mem>> -> memref<!tpu.dma_semaphore, #tpu.memory_space<semaphore_mem>>
    tpu.wait_dma2 semaphore(%158 : memref<!tpu.dma_semaphore, #tpu.memory_space<semaphore_mem>>) src(%155 : memref<1x128xi32, #tpu.memory_space<any>>) dst(%156 : memref<1x128xi32, #tpu.memory_space<vmem>>)
    %c0_122 = arith.constant 0 : index
    %c0_123 = arith.constant 0 : index
    %159 = vector.load %arg7[%c0_122, %c0_123] : memref<16x128xi32, #tpu.memory_space<vmem>>, vector<16x128xi32>
    %160 = arith.sitofp %159 : vector<16x128xi32> to vector<16x128xf32>
    %cst = arith.constant dense<0.000000e+00> : vector<16x128xf32>
    %161 = tpu.matmul %160, %94, %cst {dimension_numbers = #tpu.dot_dimension_numbers<[1], [0], [0], [1], [0, 0, 1, 1], [], []>, precision = #tpu.contract_precision<fp32>} : vector<16x128xf32>, vector<128x128xf32>, vector<16x128xf32> -> vector<16x128xf32>
    %162 = vector.extract_strided_slice %161 {offsets = [0, 0], sizes = [8, 128], strides = [1, 1]} : vector<16x128xf32> to vector<8x128xf32>
    %163 = arith.fptosi %162 : vector<8x128xf32> to vector<8x128xi32>
    %c0_124 = arith.constant 0 : index
    %c0_125 = arith.constant 0 : index
    %164 = vector.load %arg5[%c0_124, %c0_125] : memref<8x128xi32, #tpu.memory_space<vmem>>, vector<8x128xi32>
    tpu.vector_store %arg5[%c0_124, %c0_125], %163 {strides = array<i32>} : memref<8x128xi32, #tpu.memory_space<vmem>>, vector<8x128xi32>,
    %165 = vector.extract_strided_slice %161 {offsets = [8, 0], sizes = [8, 128], strides = [1, 1]} : vector<16x128xf32> to vector<8x128xf32>
    %166 = arith.fptosi %165 : vector<8x128xf32> to vector<8x128xi32>
    %c0_126 = arith.constant 0 : index
    %c0_127 = arith.constant 0 : index
    %167 = vector.load %arg6[%c0_126, %c0_127] : memref<8x128xi32, #tpu.memory_space<vmem>>, vector<8x128xi32>
    tpu.vector_store %arg6[%c0_126, %c0_127], %166 {strides = array<i32>} : memref<8x128xi32, #tpu.memory_space<vmem>>, vector<8x128xi32>,
    return
  }
  func.func @transform_0(%arg0: i32, %arg1: memref<16xi32, #tpu.memory_space<smem>>) -> (i32, i32) {
    %c0_i32 = arith.constant 0 : i32
    %c0_i32_0 = arith.constant 0 : i32
    %c0_i32_1 = arith.constant 0 : i32
    return %c0_i32, %c0_i32_0 : i32, i32
  }
  func.func @transform_3(%arg0: i32, %arg1: memref<16xi32, #tpu.memory_space<smem>>) -> (i32, i32) {
    %c0_i32 = arith.constant 0 : i32
    %c0_i32_0 = arith.constant 0 : i32
    return %arg0, %c0_i32 : i32, i32
  }
  func.func @transform_4(%arg0: i32, %arg1: memref<16xi32, #tpu.memory_space<smem>>) -> (i32, i32) {
    %c0_i32 = arith.constant 0 : i32
    %c0_i32_0 = arith.constant 0 : i32
    return %arg0, %c0_i32 : i32, i32
  }
}

</mosaic_0001>

<bundles_post_ra>
// kernel: tpu_custom_call.1
= control target key start
LH: loop header
LB: loop body
LE: loop exit
PB: predicated region body
PF: predicated region fallthrough
CT: control target
= control target key end

     0   :  { %s3732_s0 = inlined_call_operand.hbm [shape: s32[16], index: 0, kind: input, shape index: {}]   ;;  %s3733_s1 = inlined_call_operand.vmem [shape: s32[1,128], index: 1, kind: input, shape index: {}]   ;;  %s3734_s2 = inlined_call_operand.hbm [shape: s32[32,128], index: 2, kind: input, shape index: {}]   ;;  %s3735_s3 = inlined_call_operand.hbm [shape: s32[32,128], index: 3, kind: input, shape index: {}]   ;;  %s3736_s4 = inlined_call_operand.hbm [shape: s32[16,128], index: 4, kind: output, shape index: {0}]   ;;  %s3737_s5 = inlined_call_operand.hbm [shape: s32[16,128], index: 5, kind: output, shape index: {1}]  }
   0x1   :  { %3746 = sst [smem:[#allocation69_spill]] %s3733_s1  ;;  %s2139_s20 = scalar_lea.hbm %s3732_s0, 16 }
   0x2   :  { %p2140_p0 = scmp.ne.s32.totalorder %s3732_s0, %s2139_s20  ;;  %p2143_p1 = scmp.lt.u32.totalorder %s2139_s20, %s3732_s0 }
   0x4   :  { %p2145_p2 = pnand %p2143_p1, %p2140_p0 }
   0x6   :  { %2148 = shalt.err (!%p2145_p2)  }
   0x7   :  { %s2663_s25 = smov [#allocation5]  }
   0x8   :  { %12 = dma.hbm_to_smem %s3732_s0, 16, %s2663_s25, [#allocation4] }
   0x9   :  { %2605 = dma.done.wait [#allocation4], 16 }
   0xa   :  { %2606 = vsyncadd [#allocation4], 4294967280 }
   0xb   :  { %14 = sfence }
   0xc   :  { %15 = vsyncpa [#allocation7], 0 }
   0xd   :  { %17 = vsyncpa [#allocation7 + $0x1], 0 }
   0xe   :  { %18 = vsyncpa [#allocation9], 0 }
   0xf   :  { %20 = vsyncpa [#allocation9 + $0x1], 0  ;;  %s2726_s28 = smov 0   ;;  %s2728_s29 = smov 0  }
  0x10   :  { %s2730_s30 = smov 0   ;;  %s2732_s6 = smov 0  }
  0x11 LB: > { %3747 = sst [smem:[#allocation63_spill]] %s2649_s28  ;;  %s2747_s0 = sadd.s32 4294967295, %s2661_s6   ;;  %s2661_s6 = sphi %s2732_s6, %s3778_s6   ;;  %s2657_s30 = sphi %s2730_s30, %s3781_s30   ;;  %s2653_s29 = sphi %s2728_s29, %s3780_s29   ;;  %s2649_s28 = sphi %s2726_s28, %s3779_s28  }
  0x12   : > { %3748 = sst [smem:[#allocation64_spill]] %s2653_s29  ;;  %s1443_s7 = sadd.s32 4294967294, %s2661_s6  }
  0x13   : > { %3749 = sst [smem:[#allocation65_spill]] %s2657_s30  ;;  %s2751_s8 = sadd.s32 1, %s2661_s6  }
  0x14   : > { %3750 = sst [smem:[#allocation66_spill]] %s2751_s8  ;;  %s54_s9 = sadd.s32 1, %s2657_s30 }
  0x15   : > { %s51_s10 = ssub.s32 %s2661_s6, %s2751_s8  ;;  %p64_p3 = scmp.ne.s32.totalorder %s2657_s30, %s2653_s29 }
  0x16   : > { %p52_p4 = scmp.eq.s32.totalorder %s51_s10, 0  ;;  %p65_p5 = scmp.eq.s32.totalorder %s2747_s0, 1 }
  0x17   : > { %p70_p6 = scmp.ne.s32.totalorder %s2653_s29, %s2649_s28  ;;  %p71_p7 = scmp.eq.s32.totalorder %s1443_s7, 1 }
  0x18   : > { %s2762_s11 = scalar_select %p52_p4, %s2657_s30, %s54_s9  }
  0x19   : > { %p2764_p8 = por %p65_p5, %p64_p3  ;;  %p2768_p9 = por %p71_p7, %p70_p6 }
  0x1a   : > { %3751 = sst [smem:[#allocation67_spill]] %s2762_s11  ;;  %p1445_p10 = scmp.ge.s32.totalorder %s2661_s6, 1 }
  0x1b   : > { %s3753_s13 = scalar_select %p2768_p9, 1, 0 }
  0x1c   : > { %p118_p11 = scmp.lt.s32.totalorder %s2661_s6, 3 }
  0x1d   : > { %3754 = sst [smem:[#allocation68_spill]] %s3753_s13 }
  0x1e   : > { %p119_p12 = pnand %p1445_p10, %p118_p11 }
  0x1f   : > { %s2775_s14 = sand.u32 (!%p119_p12), 1, %s2653_s29   ;;  %s2778_s15 = sshll.u32 (!%p119_p12), %s2747_s0, 3  ;;  %v394_v0 = vlaneseq (!%p119_p12) }
  0x20   : > { %122 = sbr.rel (%p119_p12) target bundleno = 769 (0x301), region = 24  ;;  %s2782_s17 = sld [smem:[#allocation5 + %s2778_s15]] (!%p119_p12) }
  0x21   : > { %v2784_v1 = vshrl.u32 (!%p119_p12), %v394_v0, 7  ;;  %s3755_s1 = sld [smem:[#allocation69_spill]] (!%p119_p12)  ;;  %s2664_s20 = smov (!%p119_p12), [#allocation2]  }
  0x22   : > { %s151_s21 = sshll.u32 (!%p119_p12), %s2664_s20, 4  ;;  %s2665_s22 = smov (!%p119_p12), [#allocation2 + $0x8]   ;;  %s2803_s21 = int_to_ptr.vmem [resolvable:$true] %s151_s21 }
  0x23   : > { %s166_s23 = sshll.u32 (!%p119_p12), %s2665_s22, 4  ;;  %v2792_v3 = vadd.s32 (!%p119_p12), 8, %v2784_v1  ;;  %v2795_v4 = vadd.s32 (!%p119_p12), 16, %v2784_v1  ;;  %v2798_v5 = vadd.s32 (!%p119_p12), 24, %v2784_v1  ;;  %v2801_v6 = vadd.s32 (!%p119_p12), 32, %v2784_v1  ;;  %s170_s24 = sadd.s32 (!%p119_p12), 1, %s2778_s15  ;;  %s2805_s23 = int_to_ptr.vmem [resolvable:$true] %s166_s23 }
  0x24   : > { %v2808_v7 = vadd.s32 (!%p119_p12), 40, %v2784_v1  ;;  %v2811_v8 = vadd.s32 (!%p119_p12), 48, %v2784_v1  ;;  %v2814_v9 = vadd.s32 (!%p119_p12), 56, %v2784_v1  ;;  %v2817_v10 = vadd.s32 (!%p119_p12), 64, %v2784_v1  ;;  %s2833_s26 = sld [smem:[#allocation5 + %s170_s24]] (!%p119_p12)  ;;  %s2865_s24 = scalar_lea.hbm (!%p119_p12), %s3734_s2, 512 }
  0x25   : > { %v2821_v11 = vadd.s32 (!%p119_p12), 72, %v2784_v1  ;;  %v2824_v12 = vadd.s32 (!%p119_p12), 80, %v2784_v1  ;;  %v2827_v13 = vadd.s32 (!%p119_p12), 88, %v2784_v1  ;;  %v2830_v14 = vadd.s32 (!%p119_p12), 96, %v2784_v1 }
  0x26   : > { %s1449_s25 = sshll.u32 (!%p119_p12), %s2782_s17, 4  ;;  %v2836_v15 = vadd.s32 (!%p119_p12), 104, %v2784_v1  ;;  %v2839_v16 = vadd.s32 (!%p119_p12), 112, %v2784_v1  ;;  %v2842_v17 = vadd.s32 (!%p119_p12), 120, %v2784_v1 }
  0x27   : > { %v2789_v2 = vld [vmem:[%s3755_s1] ss:$0 sm:$0xff]  ;;  %s143_s9 = scalar_lea.hbm %s3734_s2, %s1449_s25  ;;  %s2852_s18 = scalar_lea.hbm %s3735_s3, %s1449_s25 }
  0x28   : > { %vm416_vm0 = vcmp.eq.s32.totalorder %v2784_v1, %v2789_v2  ;;  %vm417_vm1 = vcmp.eq.s32.totalorder %v2792_v3, %v2789_v2  ;;  %vm418_vm2 = vcmp.eq.s32.totalorder %v2795_v4, %v2789_v2  ;;  %vm419_vm3 = vcmp.eq.s32.totalorder %v2798_v5, %v2789_v2  ;;  %s2149_s19 = scalar_lea.hbm %s143_s9, 16  ;;  %p2152_p0 = scmp.lt.u32.totalorder %s143_s9, %s3734_s2 }
  0x29   : > { %vm420_vm4 = vcmp.eq.s32.totalorder %v2801_v6, %v2789_v2  ;;  %p2150_p13 = scmp.ne.s32.totalorder %s143_s9, %s2149_s19  ;;  %p2153_p1 = scmp.lt.u32.totalorder %s2865_s24, %s2149_s19 }
  0x2a   : > { %p2155_p3 = scmp.lt.u32.totalorder %s2149_s19, %s143_s9 }
  0x2b   : > { %p2154_p2 = por %p2153_p1, %p2152_p0 }
  0x2d   : > { %p2156_p4 = por %p2155_p3, %p2154_p2 }
  0x2f   : > { %p2157_p5 = pnand %p2156_p4, %p2150_p13 }
  0x31   : > { %2160 = shalt.err (!%p2157_p5)  }
  0x32   : > { %s2161_s7 = scalar_lea.vmem %s2803_s21, 16  ;;  %s2874_s10 = scalar_lea.vmem %s2803_s21, 256 }
  0x33   : > { %p2162_p6 = scmp.ne.s32.totalorder %s2803_s21, %s2161_s7  ;;  %p2166_p7 = scmp.lt.s32.totalorder %s2803_s21, %s2803_s21 }
  0x34   : > { %p2167_p10 = scmp.lt.s32.totalorder %s2874_s10, %s2161_s7 }
  0x36   : > { %p2168_p11 = por %p2167_p10, %p2166_p7 }
  0x38   : > { %p2169_p12 = pnand %p2168_p11, %p2162_p6 }
  0x3a   : > { %2172 = shalt.err (!%p2169_p12)  }
  0x3b   : > { %154 = dma.hbm_to_vmem [thread:$0]  %s143_s9, 16, %s2803_s21, [#allocation3]  ;;  %vm421_vm5 = vcmp.eq.s32.totalorder %v2808_v7, %v2789_v2  ;;  %vm422_vm6 = vcmp.eq.s32.totalorder %v2811_v8, %v2789_v2  ;;  %vm423_vm7 = vcmp.eq.s32.totalorder %v2814_v9, %v2789_v2  ;;  %vm424_vm8 = vcmp.eq.s32.totalorder %v2817_v10, %v2789_v2 }
  0x3c   : > { %s2173_s17 = scalar_lea.hbm %s2852_s18, 16  ;;  %s2893_s22 = scalar_lea.hbm %s3735_s3, 512 }
  0x3d   : > { %p2174_p13 = scmp.ne.s32.totalorder %s2852_s18, %s2173_s17  ;;  %p2176_p0 = scmp.lt.u32.totalorder %s2852_s18, %s3735_s3 }
  0x3e   : > { %p2177_p1 = scmp.lt.u32.totalorder %s2893_s22, %s2173_s17  ;;  %p2179_p3 = scmp.lt.u32.totalorder %s2173_s17, %s2852_s18 }
  0x40   : > { %p2178_p2 = por %p2177_p1, %p2176_p0 }
  0x42   : > { %p2180_p4 = por %p2179_p3, %p2178_p2 }
  0x44   : > { %p2181_p5 = pnand %p2180_p4, %p2174_p13 }
  0x46   : > { %2184 = shalt.err (!%p2181_p5)  }
  0x47   : > { %s2185_s27 = scalar_lea.vmem %s2805_s23, 16  ;;  %p2190_p7 = scmp.lt.s32.totalorder %s2805_s23, %s2803_s21 }
  0x48   : > { %p2186_p6 = scmp.ne.s32.totalorder %s2805_s23, %s2185_s27  ;;  %p2191_p10 = scmp.lt.s32.totalorder %s2874_s10, %s2185_s27 }
  0x4a   : > { %p2192_p11 = por %p2191_p10, %p2190_p7 }
  0x4c   : > { %p2193_p12 = pnand %p2192_p11, %p2186_p6 }
  0x4e   : > { %2196 = shalt.err (!%p2193_p12)  }
  0x4f   : > { %169 = dma.hbm_to_vmem [thread:$0]  %s2852_s18, 16, %s2805_s23, [#allocation3 + $0x8]  ;;  %vm425_vm9 = vcmp.eq.s32.totalorder %v2821_v11, %v2789_v2  ;;  %vm426_vm10 = vcmp.eq.s32.totalorder %v2824_v12, %v2789_v2  ;;  %vm427_vm11 = vcmp.eq.s32.totalorder %v2827_v13, %v2789_v2  ;;  %vm428_vm12 = vcmp.eq.s32.totalorder %v2830_v14, %v2789_v2 }
  0x50   : > { %s2666_s7 = smov [#allocation2 + $0x1]   ;;  %vm429_vm13 = vcmp.eq.s32.totalorder %v2836_v15, %v2789_v2  ;;  %vm3745_vm14 = vcmp.eq.s32.totalorder %v2839_v16, %v2789_v2  ;;  %vm3744_vm15 = vcmp.eq.s32.totalorder %v2842_v17, %v2789_v2  ;;  %v2667_v18 = vmov 0.0   ;;  %s2668_s23 = smov [#allocation2 + $0x9]  }
  0x51   : > { %s183_s17 = sshll.u32 %s2666_s7, 4  ;;  %v2925_v19 = vsel %vm416_vm0, 1.0, %v2667_v18  ;;  %s198_s18 = sshll.u32 %s2668_s23, 4  ;;  %v2932_v20 = vsel %vm417_vm1, 1.0, %v2667_v18  ;;  %v2937_v21 = vsel %vm418_vm2, 1.0, %v2667_v18  ;;  %v2942_v22 = vsel %vm419_vm3, 1.0, %v2667_v18  ;;  %s2927_s17 = int_to_ptr.vmem [resolvable:$true] %s183_s17  ;;  %s2950_s18 = int_to_ptr.vmem [resolvable:$true] %s198_s18 }
  0x52   : > { %v2947_v23 = vsel %vm420_vm4, 1.0, %v2667_v18  ;;  %s1451_s19 = sshll.u32 %s2833_s26, 4  ;;  %v2955_v24 = vsel %vm421_vm5, 1.0, %v2667_v18  ;;  %v2960_v25 = vsel %vm422_vm6, 1.0, %v2667_v18  ;;  %v2965_v26 = vsel %vm423_vm7, 1.0, %v2667_v18 }
  0x53   : > { %v2970_v27 = vsel %vm424_vm8, 1.0, %v2667_v18  ;;  %s173_s9 = scalar_lea.hbm %s3734_s2, %s1451_s19  ;;  %s2978_s7 = scalar_lea.hbm %s3735_s3, %s1451_s19  ;;  %v2983_v28 = vsel %vm425_vm9, 1.0, %v2667_v18  ;;  %v2988_v29 = vsel %vm426_vm10, 1.0, %v2667_v18  ;;  %v2993_v30 = vsel %vm427_vm11, 1.0, %v2667_v18 }
  0x54   : > { %v2998_v31 = vsel %vm428_vm12, 1.0, %v2667_v18  ;;  %s2197_s23 = scalar_lea.hbm %s173_s9, 16  ;;  %p2200_p0 = scmp.lt.u32.totalorder %s173_s9, %s3734_s2 }
  0x55   : > { %p2198_p13 = scmp.ne.s32.totalorder %s173_s9, %s2197_s23  ;;  %p2201_p1 = scmp.lt.u32.totalorder %s2865_s24, %s2197_s23 }
  0x56   : > { %p2203_p3 = scmp.lt.u32.totalorder %s2197_s23, %s173_s9 }
  0x57   : > { %p2202_p2 = por %p2201_p1, %p2200_p0 }
  0x59   : > { %p2204_p4 = por %p2203_p3, %p2202_p2 }
  0x5b   : > { %p2205_p5 = pnand %p2204_p4, %p2198_p13 }
  0x5d   : > { %2208 = shalt.err (!%p2205_p5)  }
  0x5e   : > { %s2209_s20 = scalar_lea.vmem %s2927_s17, 16  ;;  %p2214_p7 = scmp.lt.s32.totalorder %s2927_s17, %s2803_s21 }
  0x5f   : > { %p2210_p6 = scmp.ne.s32.totalorder %s2927_s17, %s2209_s20  ;;  %p2215_p10 = scmp.lt.s32.totalorder %s2874_s10, %s2209_s20 }
  0x61   : > { %p2216_p11 = por %p2215_p10, %p2214_p7 }
  0x63   : > { %p2217_p12 = pnand %p2216_p11, %p2210_p6 }
  0x65   : > { %2220 = shalt.err (!%p2217_p12)  }
  0x66   : > { %186 = dma.hbm_to_vmem [thread:$0]  %s173_s9, 16, %s2927_s17, [#allocation3 + $0x1]  ;;  %v3013_v32 = vsel %vm429_vm13, 1.0, %v2667_v18  ;;  %v3018_v33 = vsel %vm3745_vm14, 1.0, %v2667_v18  ;;  %v3023_v34 = vsel %vm3744_vm15, 1.0, %v2667_v18 }
  0x67   : > { %s2221_s25 = scalar_lea.hbm %s2978_s7, 16  ;;  %p2224_p0 = scmp.lt.u32.totalorder %s2978_s7, %s3735_s3 }
  0x68   : > { %p2222_p13 = scmp.ne.s32.totalorder %s2978_s7, %s2221_s25  ;;  %p2225_p1 = scmp.lt.u32.totalorder %s2893_s22, %s2221_s25 }
  0x69   : > { %p2227_p3 = scmp.lt.u32.totalorder %s2221_s25, %s2978_s7 }
  0x6a   : > { %p2226_p2 = por %p2225_p1, %p2224_p0 }
  0x6c   : > { %p2228_p4 = por %p2227_p3, %p2226_p2 }
  0x6e   : > { %p2229_p5 = pnand %p2228_p4, %p2222_p13 }
  0x70   : > { %2232 = shalt.err (!%p2229_p5)  }
  0x71   : > { %s2233_s17 = scalar_lea.vmem %s2950_s18, 16  ;;  %p2238_p7 = scmp.lt.s32.totalorder %s2950_s18, %s2803_s21 }
  0x72   : > { %p2234_p6 = scmp.ne.s32.totalorder %s2950_s18, %s2233_s17  ;;  %p2239_p10 = scmp.lt.s32.totalorder %s2874_s10, %s2233_s17 }
  0x74   : > { %p2240_p11 = por %p2239_p10, %p2238_p7 }
  0x76   : > { %p2241_p12 = pnand %p2240_p11, %p2234_p6 }
  0x78   : > { %2244 = shalt.err (!%p2241_p12)  }
  0x79   : > { %201 = dma.hbm_to_vmem [thread:$0]  %s2978_s7, 16, %s2950_s18, [#allocation3 + $0x9] }
  0x7a   : > { %s202_s9 = sadd.s32 2, %s2778_s15  ;;  %s2669_s26 = smov [#allocation2 + $0x2]  }
  0x7b   : > { %s203_s19 = sld [smem:[#allocation5 + %s202_s9]]  ;;  %s215_s20 = sshll.u32 %s2669_s26, 4  ;;  %s3041_s20 = int_to_ptr.vmem [resolvable:$true] %s215_s20 }
  0x7c   : > { %s2670_s25 = smov [#allocation2 + $0xa]   ;;  %s234_s23 = sadd.s32 3, %s2778_s15 }
  0x7d   : > { %s230_s27 = sshll.u32 %s2670_s25, 4  ;;  %s3046_s17 = sld [smem:[#allocation5 + %s234_s23]]  ;;  %s3044_s27 = int_to_ptr.vmem [resolvable:$true] %s230_s27 }
  0x7e   : > { %s2671_s16 = smov [#allocation2 + $0x3]   ;;  %s2672_s11 = smov [#allocation2 + $0xb]  }
  0x7f   : > { %s247_s1 = sshll.u32 %s2671_s16, 4  ;;  %s3048_s30 = sshll.u32 %s2672_s11, 4  ;;  %s3050_s1 = int_to_ptr.vmem [resolvable:$true] %s247_s1  ;;  %s3087_s30 = int_to_ptr.vmem [resolvable:$true] %s3048_s30 }
  0x81   : > { %s1453_s18 = sshll.u32 %s203_s19, 4 }
  0x82   : > { %s205_s26 = scalar_lea.hbm %s3734_s2, %s1453_s18  ;;  %s3058_s25 = scalar_lea.hbm %s3735_s3, %s1453_s18 }
  0x83   : > { %s2245_s13 = scalar_lea.hbm %s205_s26, 16  ;;  %p2248_p0 = scmp.lt.u32.totalorder %s205_s26, %s3734_s2 }
  0x84   : > { %p2246_p13 = scmp.ne.s32.totalorder %s205_s26, %s2245_s13  ;;  %p2249_p1 = scmp.lt.u32.totalorder %s2865_s24, %s2245_s13 }
  0x85   : > { %p2251_p3 = scmp.lt.u32.totalorder %s2245_s13, %s205_s26 }
  0x86   : > { %p2250_p2 = por %p2249_p1, %p2248_p0 }
  0x88   : > { %p2252_p4 = por %p2251_p3, %p2250_p2 }
  0x8a   : > { %p2253_p5 = pnand %p2252_p4, %p2246_p13 }
  0x8c   : > { %2256 = shalt.err (!%p2253_p5)  }
  0x8d   : > { %s2257_s29 = scalar_lea.vmem %s3041_s20, 16  ;;  %p2262_p7 = scmp.lt.s32.totalorder %s3041_s20, %s2803_s21 }
  0x8e   : > { %p2258_p6 = scmp.ne.s32.totalorder %s3041_s20, %s2257_s29  ;;  %p2263_p10 = scmp.lt.s32.totalorder %s2874_s10, %s2257_s29 }
  0x90   : > { %p2264_p11 = por %p2263_p10, %p2262_p7 }
  0x92   : > { %p2265_p12 = pnand %p2264_p11, %p2258_p6 }
  0x94   : > { %2268 = shalt.err (!%p2265_p12)  }
  0x95   : > { %218 = dma.hbm_to_vmem [thread:$0]  %s205_s26, 16, %s3041_s20, [#allocation3 + $0x2] }
  0x96   : > { %s2269_s28 = scalar_lea.hbm %s3058_s25, 16  ;;  %p2272_p0 = scmp.lt.u32.totalorder %s3058_s25, %s3735_s3 }
  0x97   : > { %p2270_p13 = scmp.ne.s32.totalorder %s3058_s25, %s2269_s28  ;;  %p2273_p1 = scmp.lt.u32.totalorder %s2893_s22, %s2269_s28 }
  0x98   : > { %p2275_p3 = scmp.lt.u32.totalorder %s2269_s28, %s3058_s25 }
  0x99   : > { %p2274_p2 = por %p2273_p1, %p2272_p0 }
  0x9b   : > { %p2276_p4 = por %p2275_p3, %p2274_p2 }
  0x9d   : > { %p2277_p5 = pnand %p2276_p4, %p2270_p13 }
  0x9f   : > { %2280 = shalt.err (!%p2277_p5)  }
  0xa0   : > { %s2281_s13 = scalar_lea.vmem %s3044_s27, 16  ;;  %p2286_p7 = scmp.lt.s32.totalorder %s3044_s27, %s2803_s21 }
  0xa1   : > { %p2282_p6 = scmp.ne.s32.totalorder %s3044_s27, %s2281_s13  ;;  %p2287_p10 = scmp.lt.s32.totalorder %s2874_s10, %s2281_s13 }
  0xa3   : > { %p2288_p11 = por %p2287_p10, %p2286_p7 }
  0xa5   : > { %p2289_p12 = pnand %p2288_p11, %p2282_p6 }
  0xa7   : > { %2292 = shalt.err (!%p2289_p12)  }
  0xa8   : > { %233 = dma.hbm_to_vmem [thread:$0]  %s3058_s25, 16, %s3044_s27, [#allocation3 + $0xa] }
  0xa9   : > { %s1455_s16 = sshll.u32 %s3046_s17, 4 }
  0xaa   : > { %s237_s18 = scalar_lea.hbm %s3734_s2, %s1455_s16  ;;  %s3095_s26 = scalar_lea.hbm %s3735_s3, %s1455_s16 }
  0xab   : > { %s2293_s23 = scalar_lea.hbm %s237_s18, 16  ;;  %p2296_p0 = scmp.lt.u32.totalorder %s237_s18, %s3734_s2 }
  0xac   : > { %p2294_p13 = scmp.ne.s32.totalorder %s237_s18, %s2293_s23  ;;  %p2297_p1 = scmp.lt.u32.totalorder %s2865_s24, %s2293_s23 }
  0xad   : > { %p2299_p3 = scmp.lt.u32.totalorder %s2293_s23, %s237_s18 }
  0xae   : > { %p2298_p2 = por %p2297_p1, %p2296_p0 }
  0xb0   : > { %p2300_p4 = por %p2299_p3, %p2298_p2 }
  0xb2   : > { %p2301_p5 = pnand %p2300_p4, %p2294_p13 }
  0xb4   : > { %2304 = shalt.err (!%p2301_p5)  }
  0xb5   : > { %s2305_s27 = scalar_lea.vmem %s3050_s1, 16  ;;  %p2310_p7 = scmp.lt.s32.totalorder %s3050_s1, %s2803_s21 }
  0xb6   : > { %p2306_p6 = scmp.ne.s32.totalorder %s3050_s1, %s2305_s27  ;;  %p2311_p10 = scmp.lt.s32.totalorder %s2874_s10, %s2305_s27 }
  0xb8   : > { %p2312_p11 = por %p2311_p10, %p2310_p7 }
  0xba   : > { %p2313_p12 = pnand %p2312_p11, %p2306_p6 }
  0xbc   : > { %2316 = shalt.err (!%p2313_p12)  }
  0xbd   : > { %250 = dma.hbm_to_vmem [thread:$0]  %s237_s18, 16, %s3050_s1, [#allocation3 + $0x3] }
  0xbe   : > { %s2317_s17 = scalar_lea.hbm %s3095_s26, 16  ;;  %p2320_p0 = scmp.lt.u32.totalorder %s3095_s26, %s3735_s3 }
  0xbf   : > { %p2318_p13 = scmp.ne.s32.totalorder %s3095_s26, %s2317_s17  ;;  %p2321_p1 = scmp.lt.u32.totalorder %s2893_s22, %s2317_s17 }
  0xc0   : > { %p2323_p3 = scmp.lt.u32.totalorder %s2317_s17, %s3095_s26 }
  0xc1   : > { %p2322_p2 = por %p2321_p1, %p2320_p0 }
  0xc3   : > { %p2324_p4 = por %p2323_p3, %p2322_p2 }
  0xc5   : > { %p2325_p5 = pnand %p2324_p4, %p2318_p13 }
  0xc7   : > { %2328 = shalt.err (!%p2325_p5)  }
  0xc8   : > { %s2329_s11 = scalar_lea.vmem %s3087_s30, 16  ;;  %p2334_p7 = scmp.lt.s32.totalorder %s3087_s30, %s2803_s21 }
  0xc9   : > { %p2330_p6 = scmp.ne.s32.totalorder %s3087_s30, %s2329_s11  ;;  %p2335_p10 = scmp.lt.s32.totalorder %s2874_s10, %s2329_s11 }
  0xcb   : > { %p2336_p11 = por %p2335_p10, %p2334_p7 }
  0xcd   : > { %p2337_p12 = pnand %p2336_p11, %p2330_p6 }
  0xcf   : > { %2340 = shalt.err (!%p2337_p12)  }
  0xd0   : > { %265 = dma.hbm_to_vmem [thread:$0]  %s3095_s26, 16, %s3087_s30, [#allocation3 + $0xb] }
  0xd1   : > { %s266_s1 = sadd.s32 4, %s2778_s15  ;;  %s2673_s16 = smov [#allocation2 + $0x4]  }
  0xd2   : > { %s267_s13 = sld [smem:[#allocation5 + %s266_s1]]  ;;  %s279_s19 = sshll.u32 %s2673_s16, 4  ;;  %s3123_s19 = int_to_ptr.vmem [resolvable:$true] %s279_s19 }
  0xd3   : > { %s2674_s20 = smov [#allocation2 + $0xc]   ;;  %s298_s7 = sadd.s32 5, %s2778_s15 }
  0xd4   : > { %s294_s18 = sshll.u32 %s2674_s20, 4  ;;  %s3128_s9 = sld [smem:[#allocation5 + %s298_s7]]  ;;  %s3126_s18 = int_to_ptr.vmem [resolvable:$true] %s294_s18 }
  0xd5   : > { %s2675_s23 = smov [#allocation2 + $0x5]   ;;  %s2676_s28 = smov [#allocation2 + $0xd]  }
  0xd6   : > { %s311_s29 = sshll.u32 %s2675_s23, 4  ;;  %s3130_s27 = sshll.u32 %s2676_s28, 4  ;;  %s3132_s29 = int_to_ptr.vmem [resolvable:$true] %s311_s29  ;;  %s3169_s27 = int_to_ptr.vmem [resolvable:$true] %s3130_s27 }
  0xd8   : > { %s1457_s30 = sshll.u32 %s267_s13, 4 }
  0xd9   : > { %s269_s25 = scalar_lea.hbm %s3734_s2, %s1457_s30  ;;  %s3140_s1 = scalar_lea.hbm %s3735_s3, %s1457_s30 }
  0xda   : > { %s2341_s16 = scalar_lea.hbm %s269_s25, 16  ;;  %p2344_p0 = scmp.lt.u32.totalorder %s269_s25, %s3734_s2 }
  0xdb   : > { %p2342_p13 = scmp.ne.s32.totalorder %s269_s25, %s2341_s16  ;;  %p2345_p1 = scmp.lt.u32.totalorder %s2865_s24, %s2341_s16 }
  0xdc   : > { %p2347_p3 = scmp.lt.u32.totalorder %s2341_s16, %s269_s25 }
  0xdd   : > { %p2346_p2 = por %p2345_p1, %p2344_p0 }
  0xdf   : > { %p2348_p4 = por %p2347_p3, %p2346_p2 }
  0xe1   : > { %p2349_p5 = pnand %p2348_p4, %p2342_p13 }
  0xe3   : > { %2352 = shalt.err (!%p2349_p5)  }
  0xe4   : > { %s2353_s13 = scalar_lea.vmem %s3123_s19, 16  ;;  %p2358_p7 = scmp.lt.s32.totalorder %s3123_s19, %s2803_s21 }
  0xe5   : > { %p2354_p6 = scmp.ne.s32.totalorder %s3123_s19, %s2353_s13  ;;  %p2359_p10 = scmp.lt.s32.totalorder %s2874_s10, %s2353_s13 }
  0xe7   : > { %p2360_p11 = por %p2359_p10, %p2358_p7 }
  0xe9   : > { %p2361_p12 = pnand %p2360_p11, %p2354_p6 }
  0xeb   : > { %2364 = shalt.err (!%p2361_p12)  }
  0xec   : > { %282 = dma.hbm_to_vmem [thread:$0]  %s269_s25, 16, %s3123_s19, [#allocation3 + $0x4] }
  0xed   : > { %s2365_s23 = scalar_lea.hbm %s3140_s1, 16  ;;  %p2368_p0 = scmp.lt.u32.totalorder %s3140_s1, %s3735_s3 }
  0xee   : > { %p2366_p13 = scmp.ne.s32.totalorder %s3140_s1, %s2365_s23  ;;  %p2369_p1 = scmp.lt.u32.totalorder %s2893_s22, %s2365_s23 }
  0xef   : > { %p2371_p3 = scmp.lt.u32.totalorder %s2365_s23, %s3140_s1 }
  0xf0   : > { %p2370_p2 = por %p2369_p1, %p2368_p0 }
  0xf2   : > { %p2372_p4 = por %p2371_p3, %p2370_p2 }
  0xf4   : > { %p2373_p5 = pnand %p2372_p4, %p2366_p13 }
  0xf6   : > { %2376 = shalt.err (!%p2373_p5)  }
  0xf7   : > { %s2377_s26 = scalar_lea.vmem %s3126_s18, 16  ;;  %p2382_p7 = scmp.lt.s32.totalorder %s3126_s18, %s2803_s21 }
  0xf8   : > { %p2378_p6 = scmp.ne.s32.totalorder %s3126_s18, %s2377_s26  ;;  %p2383_p10 = scmp.lt.s32.totalorder %s2874_s10, %s2377_s26 }
  0xfa   : > { %p2384_p11 = por %p2383_p10, %p2382_p7 }
  0xfc   : > { %p2385_p12 = pnand %p2384_p11, %p2378_p6 }
  0xfe   : > { %2388 = shalt.err (!%p2385_p12)  }
  0xff   : > { %297 = dma.hbm_to_vmem [thread:$0]  %s3140_s1, 16, %s3126_s18, [#allocation3 + $0xc] }
 0x100   : > { %s1459_s19 = sshll.u32 %s3128_s9, 4 }
 0x101   : > { %s301_s8 = scalar_lea.hbm %s3734_s2, %s1459_s19  ;;  %s3177_s20 = scalar_lea.hbm %s3735_s3, %s1459_s19 }
 0x102   : > { %s2389_s7 = scalar_lea.hbm %s301_s8, 16  ;;  %p2392_p0 = scmp.lt.u32.totalorder %s301_s8, %s3734_s2 }
 0x103   : > { %p2390_p13 = scmp.ne.s32.totalorder %s301_s8, %s2389_s7  ;;  %p2393_p1 = scmp.lt.u32.totalorder %s2865_s24, %s2389_s7 }
 0x104   : > { %p2395_p3 = scmp.lt.u32.totalorder %s2389_s7, %s301_s8 }
 0x105   : > { %p2394_p2 = por %p2393_p1, %p2392_p0 }
 0x107   : > { %p2396_p4 = por %p2395_p3, %p2394_p2 }
 0x109   : > { %p2397_p5 = pnand %p2396_p4, %p2390_p13 }
 0x10b   : > { %2400 = shalt.err (!%p2397_p5)  }
 0x10c   : > { %s2401_s18 = scalar_lea.vmem %s3132_s29, 16  ;;  %p2406_p7 = scmp.lt.s32.totalorder %s3132_s29, %s2803_s21 }
 0x10d   : > { %p2402_p6 = scmp.ne.s32.totalorder %s3132_s29, %s2401_s18  ;;  %p2407_p10 = scmp.lt.s32.totalorder %s2874_s10, %s2401_s18 }
 0x10f   : > { %p2408_p11 = por %p2407_p10, %p2406_p7 }
 0x111   : > { %p2409_p12 = pnand %p2408_p11, %p2402_p6 }
 0x113   : > { %2412 = shalt.err (!%p2409_p12)  }
 0x114   : > { %314 = dma.hbm_to_vmem [thread:$0]  %s301_s8, 16, %s3132_s29, [#allocation3 + $0x5] }
 0x115   : > { %s2413_s9 = scalar_lea.hbm %s3177_s20, 16  ;;  %p2416_p0 = scmp.lt.u32.totalorder %s3177_s20, %s3735_s3 }
 0x116   : > { %p2414_p13 = scmp.ne.s32.totalorder %s3177_s20, %s2413_s9  ;;  %p2417_p1 = scmp.lt.u32.totalorder %s2893_s22, %s2413_s9 }
 0x117   : > { %p2419_p3 = scmp.lt.u32.totalorder %s2413_s9, %s3177_s20 }
 0x118   : > { %p2418_p2 = por %p2417_p1, %p2416_p0 }
 0x11a   : > { %p2420_p4 = por %p2419_p3, %p2418_p2 }
 0x11c   : > { %p2421_p5 = pnand %p2420_p4, %p2414_p13 }
 0x11e   : > { %2424 = shalt.err (!%p2421_p5)  }
 0x11f   : > { %s2425_s30 = scalar_lea.vmem %s3169_s27, 16  ;;  %p2430_p7 = scmp.lt.s32.totalorder %s3169_s27, %s2803_s21 }
 0x120   : > { %p2426_p6 = scmp.ne.s32.totalorder %s3169_s27, %s2425_s30  ;;  %p2431_p10 = scmp.lt.s32.totalorder %s2874_s10, %s2425_s30 }
 0x122   : > { %p2432_p11 = por %p2431_p10, %p2430_p7 }
 0x124   : > { %p2433_p12 = pnand %p2432_p11, %p2426_p6 }
 0x126   : > { %2436 = shalt.err (!%p2433_p12)  }
 0x127   : > { %329 = dma.hbm_to_vmem [thread:$0]  %s3177_s20, 16, %s3169_s27, [#allocation3 + $0xd] }
 0x128   : > { %s330_s29 = sadd.s32 6, %s2778_s15  ;;  %s2677_s19 = smov [#allocation2 + $0x6]  }
 0x129   : > { %s331_s26 = sld [smem:[#allocation5 + %s330_s29]]  ;;  %s343_s17 = sshll.u32 %s2677_s19, 4  ;;  %s3205_s17 = int_to_ptr.vmem [resolvable:$true] %s343_s17 }
 0x12a   : > { %s2678_s25 = smov [#allocation2 + $0xe]   ;;  %s362_s11 = sadd.s32 7, %s2778_s15 }
 0x12b   : > { %s358_s8 = sshll.u32 %s2678_s25, 4  ;;  %s3210_s16 = sld [smem:[#allocation5 + %s362_s11]]  ;;  %s3208_s8 = int_to_ptr.vmem [resolvable:$true] %s358_s8 }
 0x12c   : > { %s2679_s7 = smov [#allocation2 + $0x7]   ;;  %s2680_s23 = smov [#allocation2 + $0xf]  }
 0x12d   : > { %s375_s13 = sshll.u32 %s2679_s7, 4  ;;  %s3212_s18 = sshll.u32 %s2680_s23, 4  ;;  %s3214_s13 = int_to_ptr.vmem [resolvable:$true] %s375_s13  ;;  %s3251_s18 = int_to_ptr.vmem [resolvable:$true] %s3212_s18 }
 0x12f   : > { %s1461_s27 = sshll.u32 %s331_s26, 4 }
 0x130   : > { %s333_s1 = scalar_lea.hbm %s3734_s2, %s1461_s27  ;;  %s3222_s15 = scalar_lea.hbm %s3735_s3, %s1461_s27 }
 0x131   : > { %s2437_s29 = scalar_lea.hbm %s333_s1, 16  ;;  %p2440_p0 = scmp.lt.u32.totalorder %s333_s1, %s3734_s2 }
 0x132   : > { %p2438_p13 = scmp.ne.s32.totalorder %s333_s1, %s2437_s29  ;;  %p2441_p1 = scmp.lt.u32.totalorder %s2865_s24, %s2437_s29 }
 0x133   : > { %p2443_p3 = scmp.lt.u32.totalorder %s2437_s29, %s333_s1 }
 0x134   : > { %p2442_p2 = por %p2441_p1, %p2440_p0 }
 0x136   : > { %p2444_p4 = por %p2443_p3, %p2442_p2 }
 0x138   : > { %p2445_p5 = pnand %p2444_p4, %p2438_p13 }
 0x13a   : > { %2448 = shalt.err (!%p2445_p5)  }
 0x13b   : > { %s2449_s26 = scalar_lea.vmem %s3205_s17, 16  ;;  %p2454_p7 = scmp.lt.s32.totalorder %s3205_s17, %s2803_s21 }
 0x13c   : > { %p2450_p6 = scmp.ne.s32.totalorder %s3205_s17, %s2449_s26  ;;  %p2455_p10 = scmp.lt.s32.totalorder %s2874_s10, %s2449_s26 }
 0x13e   : > { %p2456_p11 = por %p2455_p10, %p2454_p7 }
 0x140   : > { %p2457_p12 = pnand %p2456_p11, %p2450_p6 }
 0x142   : > { %2460 = shalt.err (!%p2457_p12)  }
 0x143   : > { %346 = dma.hbm_to_vmem [thread:$0]  %s333_s1, 16, %s3205_s17, [#allocation3 + $0x6] }
 0x144   : > { %s2461_s11 = scalar_lea.hbm %s3222_s15, 16  ;;  %p2464_p0 = scmp.lt.u32.totalorder %s3222_s15, %s3735_s3 }
 0x145   : > { %p2462_p13 = scmp.ne.s32.totalorder %s3222_s15, %s2461_s11  ;;  %p2465_p1 = scmp.lt.u32.totalorder %s2893_s22, %s2461_s11 }
 0x146   : > { %p2467_p3 = scmp.lt.u32.totalorder %s2461_s11, %s3222_s15 }
 0x147   : > { %p2466_p2 = por %p2465_p1, %p2464_p0 }
 0x149   : > { %p2468_p4 = por %p2467_p3, %p2466_p2 }
 0x14b   : > { %p2469_p5 = pnand %p2468_p4, %p2462_p13 }
 0x14d   : > { %2472 = shalt.err (!%p2469_p5)  }
 0x14e   : > { %s2473_s27 = scalar_lea.vmem %s3208_s8, 16  ;;  %p2478_p7 = scmp.lt.s32.totalorder %s3208_s8, %s2803_s21 }
 0x14f   : > { %p2474_p6 = scmp.ne.s32.totalorder %s3208_s8, %s2473_s27  ;;  %p2479_p10 = scmp.lt.s32.totalorder %s2874_s10, %s2473_s27 }
 0x151   : > { %p2480_p11 = por %p2479_p10, %p2478_p7 }
 0x153   : > { %p2481_p12 = pnand %p2480_p11, %p2474_p6 }
 0x155   : > { %2484 = shalt.err (!%p2481_p12)  }
 0x156   : > { %361 = dma.hbm_to_vmem [thread:$0]  %s3222_s15, 16, %s3208_s8, [#allocation3 + $0xe] }
 0x157   : > { %s1463_s17 = sshll.u32 %s3210_s16, 4 }
 0x158   : > { %s365_s1 = scalar_lea.hbm %s3734_s2, %s1463_s17  ;;  %s3259_s29 = scalar_lea.hbm %s3735_s3, %s1463_s17 }
 0x159   : > { %s2485_s19 = scalar_lea.hbm %s365_s1, 16  ;;  %p2488_p0 = scmp.lt.u32.totalorder %s365_s1, %s3734_s2 }
 0x15a   : > { %p2486_p13 = scmp.ne.s32.totalorder %s365_s1, %s2485_s19  ;;  %p2489_p1 = scmp.lt.u32.totalorder %s2865_s24, %s2485_s19 }
 0x15b   : > { %p2491_p3 = scmp.lt.u32.totalorder %s2485_s19, %s365_s1 }
 0x15c   : > { %p2490_p2 = por %p2489_p1, %p2488_p0 }
 0x15e   : > { %p2492_p4 = por %p2491_p3, %p2490_p2 }
 0x160   : > { %p2493_p5 = pnand %p2492_p4, %p2486_p13 }
 0x162   : > { %2496 = shalt.err (!%p2493_p5)  }
 0x163   : > { %s2497_s8 = scalar_lea.vmem %s3214_s13, 16  ;;  %p2502_p7 = scmp.lt.s32.totalorder %s3214_s13, %s2803_s21 }
 0x164   : > { %p2498_p6 = scmp.ne.s32.totalorder %s3214_s13, %s2497_s8  ;;  %p2503_p10 = scmp.lt.s32.totalorder %s2874_s10, %s2497_s8 }
 0x166   : > { %p2504_p11 = por %p2503_p10, %p2502_p7 }
 0x168   : > { %p2505_p12 = pnand %p2504_p11, %p2498_p6 }
 0x16a   : > { %2508 = shalt.err (!%p2505_p12)  }
 0x16b   : > { %378 = dma.hbm_to_vmem [thread:$0]  %s365_s1, 16, %s3214_s13, [#allocation3 + $0x7] }
 0x16c   : > { %s2509_s24 = scalar_lea.hbm %s3259_s29, 16  ;;  %p2512_p0 = scmp.lt.u32.totalorder %s3259_s29, %s3735_s3 }
 0x16d   : > { %p2510_p13 = scmp.ne.s32.totalorder %s3259_s29, %s2509_s24  ;;  %p2513_p1 = scmp.lt.u32.totalorder %s2893_s22, %s2509_s24 }
 0x16e   : > { %p2515_p3 = scmp.lt.u32.totalorder %s2509_s24, %s3259_s29 }
 0x16f   : > { %p2514_p2 = por %p2513_p1, %p2512_p0 }
 0x171   : > { %p2516_p4 = por %p2515_p3, %p2514_p2 }
 0x173   : > { %p2517_p5 = pnand %p2516_p4, %p2510_p13 }
 0x175   : > { %2520 = shalt.err (!%p2517_p5)  }
 0x176   : > { %s2521_s11 = scalar_lea.vmem %s3251_s18, 16  ;;  %p2526_p7 = scmp.lt.s32.totalorder %s3251_s18, %s2803_s21 }
 0x177   : > { %p2522_p6 = scmp.ne.s32.totalorder %s3251_s18, %s2521_s11  ;;  %p2527_p10 = scmp.lt.s32.totalorder %s2874_s10, %s2521_s11 }
 0x179   : > { %p2528_p11 = por %p2527_p10, %p2526_p7 }
 0x17b   : > { %p2529_p12 = pnand %p2528_p11, %p2522_p6 }
 0x17d   : > { %2532 = shalt.err (!%p2529_p12)  }
 0x17e   : > { %393 = dma.hbm_to_vmem [thread:$0]  %s3259_s29, 16, %s3251_s18, [#allocation3 + $0xf] }
 0x17f   : > { %s3756_s22 = sshll.u32 %s2775_s14, 3 }
 0x180   : > { %s3288_s13 = scalar_lea.vmem [#allocation6], %s3756_s22  ;;  %s3757_s7 = smov %s3756_s22 }
 0x181   : > { %s3292_s23 = scalar_lea.vmem [#allocation8], %s3757_s7 }
 0x182   : > { %2607 = dma.done.wait [#allocation3], 16 }
 0x183   : > { %2608 = vsyncadd [#allocation3], 4294967280 }
 0x184   : > { %2609 = dma.done.wait [#allocation3 + $0x8], 16 }
 0x185   : > { %2610 = vsyncadd [#allocation3 + $0x8], 4294967280 }
 0x186   : > { %2611 = dma.done.wait [#allocation3 + $0x1], 16 }
 0x187   : > { %2612 = vsyncadd [#allocation3 + $0x1], 4294967280 }
 0x188   : > { %2613 = dma.done.wait [#allocation3 + $0x9], 16 }
 0x189   : > { %2614 = vsyncadd [#allocation3 + $0x9], 4294967280 }
 0x18a   : > { %2615 = dma.done.wait [#allocation3 + $0x2], 16 }
 0x18b   : > { %2616 = vsyncadd [#allocation3 + $0x2], 4294967280 }
 0x18c   : > { %2617 = dma.done.wait [#allocation3 + $0xa], 16 }
 0x18d   : > { %2618 = vsyncadd [#allocation3 + $0xa], 4294967280 }
 0x18e   : > { %2619 = dma.done.wait [#allocation3 + $0x3], 16 }
 0x18f   : > { %2620 = vsyncadd [#allocation3 + $0x3], 4294967280 }
 0x190   : > { %2621 = dma.done.wait [#allocation3 + $0xb], 16 }
 0x191   : > { %2622 = vsyncadd [#allocation3 + $0xb], 4294967280 }
 0x192   : > { %2623 = dma.done.wait [#allocation3 + $0x4], 16 }
 0x193   : > { %2624 = vsyncadd [#allocation3 + $0x4], 4294967280 }
 0x194   : > { %2625 = dma.done.wait [#allocation3 + $0xc], 16 }
 0x195   : > { %2626 = vsyncadd [#allocation3 + $0xc], 4294967280 }
 0x196   : > { %2627 = dma.done.wait [#allocation3 + $0x5], 16 }
 0x197   : > { %2628 = vsyncadd [#allocation3 + $0x5], 4294967280 }
 0x198   : > { %2629 = dma.done.wait [#allocation3 + $0xd], 16 }
 0x199   : > { %2630 = vsyncadd [#allocation3 + $0xd], 4294967280 }
 0x19a   : > { %2631 = dma.done.wait [#allocation3 + $0x6], 16 }
 0x19b   : > { %2632 = vsyncadd [#allocation3 + $0x6], 4294967280 }
 0x19c   : > { %2633 = dma.done.wait [#allocation3 + $0xe], 16 }
 0x19d   : > { %2634 = vsyncadd [#allocation3 + $0xe], 4294967280 }
 0x19e   : > { %2635 = dma.done.wait [#allocation3 + $0x7], 16 }
 0x19f   : > { %2636 = vsyncadd [#allocation3 + $0x7], 4294967280  ;;  %v2681_v36 = vmov 1.0|1.0  }
 0x1a0   : > { %vm3300_vm15 = vmpackc.low %vm417_vm1, %vm416_vm0 }
 0x1a1   : > { %1871 = vmatprep.subr.msk.bf16.mxu1 %vm3300_vm15, %v2681_v36  ;;  %1967 = vmatprep.subr.msk.bf16.mxu0 %vm3300_vm15, %v2681_v36  ;;  %vm3316_vm14 = vmpackc.low %vm419_vm3, %vm418_vm2 }
 0x1a2   : > { %1873 = vmatpush3.bf16.msk.msra.mxu1 %vm3300_vm15, %v2681_v36  ;;  %1969 = vmatpush3.bf16.msk.msra.mxu0 %vm3300_vm15, %v2681_v36 }
 0x1a3   : > { %1875 = vmatprep.subr.msk.bf16.mxu1 %vm3316_vm14, %v2681_v36  ;;  %1971 = vmatprep.subr.msk.bf16.mxu0 %vm3316_vm14, %v2681_v36 }
 0x1a4   : > { %2637 = dma.done.wait [#allocation3 + $0xf], 16 }
 0x1a5   : > { %2638 = vsyncadd [#allocation3 + $0xf], 4294967280  ;;  %v497_v40 = vld [vmem:[#allocation2] sm:$0xff]  ;;  %v498_v41 = vld [vmem:[#allocation2 + $0x8] sm:$0xff]  ;;  %v3378_v43 = vsub.f32 %v2925_v19, %v2925_v19  ;;  %v3382_v44 = vsub.f32 %v2932_v20, %v2932_v20  ;;  %v3406_v49 = vsub.f32 %v2937_v21, %v2937_v21  ;;  %v3421_v53 = vsub.f32 %v2942_v22, %v2942_v22  ;;  %s1532_s21 = sshll.u32 %s2747_s0, 7  ;;  %s1221_s10 = sshll.u32 %s3292_s23, 4  ;;  %s3660_s10 = int_to_ptr.vmem [resolvable:$true] %s1221_s10 }
 0x1a6   : > { %vm3338_vm0 = vmpackc.low %vm421_vm5, %vm420_vm4  ;;  %1877 = vmatpush3.bf16.msk.msra.mxu1 %vm3316_vm14, %v2681_v36  ;;  %1973 = vmatpush3.bf16.msk.msra.mxu0 %vm3316_vm14, %v2681_v36  ;;  %v499_v42 = vcvt.s32.f32 %v497_v40  ;;  %v500_v45 = vcvt.s32.f32 %v498_v41  ;;  %v3446_v58 = vsub.f32 %v2947_v23, %v2947_v23  ;;  %v3450_v59 = vsub.f32 %v2955_v24, %v2955_v24  ;;  %s1208_s18 = sshll.u32 %s3288_s13, 4  ;;  %s3658_s20 = scalar_lea.hbm %s3737_s5, %s1532_s21  ;;  %s3667_s18 = int_to_ptr.vmem [resolvable:$true] %s1208_s18 }
 0x1a7   : > { %1879 = vmatprep.subr.msk.bf16.mxu1 %vm3338_vm0, %v2681_v36  ;;  %1975 = vmatprep.subr.msk.bf16.mxu0 %vm3338_vm0, %v2681_v36  ;;  %vm3360_vm1 = vmpackc.low %vm423_vm7, %vm422_vm6  ;;  %v605_v51 = vand.u32 4294901760, %v3378_v43  ;;  %v612_v52 = vand.u32 4294901760, %v3382_v44  ;;  %v619_v57 = vand.u32 4294901760, %v3406_v49  ;;  %v626_v63 = vand.u32 4294901760, %v3421_v53  ;;  %s3665_s0 = scalar_lea.hbm %s3736_s4, %s1532_s21  ;;  %s1195_s28 = scalar_lea.sflag [#allocation9], %s2775_s14 }
 0x1a8   : > { %vm3390_vm2 = vmpackc.low %vm425_vm9, %vm424_vm8  ;;  %v3394_v47 = vand.u32 4294901760, %v499_v42  ;;  %v3396_v48 = vand.u32 4294901760, %v500_v45  ;;  %v3475_v4 = vsub.f32 %v2960_v25, %v2960_v25  ;;  %v633_v5 = vand.u32 4294901760, %v3446_v58  ;;  %s2533_s30 = scalar_lea.vmem %s3660_s10, 128  ;;  %s2682_s29 = smov [#allocation8]  }
 0x1a9   : > { %vm3429_vm3 = vmpackc.low %vm427_vm11, %vm426_vm10  ;;  %v606_v61 = vsub.f32 %v3378_v43, %v605_v51  ;;  %v613_v62 = vsub.f32 %v3382_v44, %v612_v52  ;;  %v640_v6 = vand.u32 4294901760, %v3450_v59  ;;  %v3487_v7 = vsub.f32 %v2965_v26, %v2965_v26  ;;  %p2534_p13 = scmp.ne.s32.totalorder %s3660_s10, %s2533_s30  ;;  %s2537_s19 = sshll.u32 %s2682_s29, 4  ;;  %s2538_s19 = int_to_ptr.vmem [resolvable:$false] %s2537_s19 }
 0x1aa   : > { %1881 = vmatpush3.bf16.msk.msra.mxu1 %vm3338_vm0, %v2681_v36  ;;  %1977 = vmatpush3.bf16.msk.msra.mxu0 %vm3338_vm0, %v2681_v36  ;;  %v3415_v50 = vsub.f32 %v499_v42, %v3394_v47  ;;  %v3435_v56 = vsub.f32 %v500_v45, %v3396_v48  ;;  %vm3468_vm4 = vmpackc.low %vm429_vm13, %vm428_vm12  ;;  %v620_v10 = vsub.f32 %v3406_v49, %v619_v57  ;;  %v647_v15 = vand.u32 4294901760, %v3475_v4  ;;  %s2539_s25 = scalar_lea.vmem %s2538_s19, 256  ;;  %p2540_p2 = scmp.lt.s32.totalorder %s3660_s10, %s2538_s19 }
 0x1ab   : > { %1883 = vmatprep.subr.msk.bf16.mxu1 %vm3360_vm1, %v2681_v36  ;;  %1979 = vmatprep.subr.msk.bf16.mxu0 %vm3360_vm1, %v2681_v36  ;;  %v607_v8 = vand.u32 4294901760, %v606_v61  ;;  %v614_v9 = vand.u32 4294901760, %v613_v62  ;;  %v627_v11 = vsub.f32 %v3421_v53, %v626_v63  ;;  %vm3772_vm5 = vcmp.eq.s32.totalorder %v2839_v16, %v2789_v2  ;;  %p2535_p0 = pnand %p2534_p13, %p2764_p8  ;;  %p2541_p3 = scmp.lt.s32.totalorder %s2539_s25, %s2533_s30 }
 0x1ac   : > { %v584_v55 = vand.u32 4294901760, %v3415_v50  ;;  %v594_v3 = vand.u32 4294901760, %v3435_v56  ;;  %vm3773_vm6 = vcmp.eq.s32.totalorder %v2842_v17, %v2789_v2  ;;  %v1998_v13 = vpack.c.bf16 %v612_v52, %v605_v51 }
 0x1ad   : > { %vm3503_vm7 = vmpackc.low %vm3773_vm6, %vm3772_vm5  ;;  %v634_v2 = vsub.f32 %v3446_v58, %v633_v5  ;;  %v654_v16 = vand.u32 4294901760, %v3487_v7  ;;  %v3519_v17 = vsub.f32 %v2970_v27, %v2970_v27  ;;  %v3523_v18 = vsub.f32 %v2983_v28, %v2983_v28  ;;  %p2536_p1 = pneg %p2535_p0  ;;  %p2542_p4 = por %p2541_p3, %p2540_p2 }
 0x1ae   : > { %1885 = vmatpush3.bf16.msk.msra.mxu1 %vm3360_vm1, %v2681_v36  ;;  %1981 = vmatpush3.bf16.msk.msra.mxu0 %vm3360_vm1, %v2681_v36  ;;  %v585_v60 = vsub.f32 %v3415_v50, %v584_v55  ;;  %v595_v14 = vsub.f32 %v3435_v56, %v594_v3  ;;  %v1902_v19 = vpack.c.bf16 %v614_v9, %v607_v8  ;;  %v621_v20 = vand.u32 4294901760, %v620_v10 }
 0x1af   : > { %1887 = vmatprep.subr.msk.bf16.mxu1 %vm3390_vm2, %v2681_v36  ;;  %1983 = vmatprep.subr.msk.bf16.mxu0 %vm3390_vm2, %v2681_v36  ;;  %v628_v21 = vand.u32 4294901760, %v627_v11  ;;  %v641_v22 = vsub.f32 %v3450_v59, %v640_v6  ;;  %v648_v24 = vsub.f32 %v3475_v4, %v647_v15  ;;  %v3535_v25 = vsub.f32 %v2988_v29, %v2988_v29  ;;  %p2543_p5 = pnand %p2542_p4, %p2536_p1 }
 0x1b0   : > { %1797 = vmatprep.mubr.f32.mxu0 %v584_v55  ;;  %v586_v1 = vand.u32 4294901760, %v585_v60  ;;  %v596_v23 = vand.u32 4294901760, %v595_v14  ;;  %v2002_v26 = vpack.c.bf16 %v626_v63, %v619_v57  ;;  %v655_v27 = vsub.f32 %v3487_v7, %v654_v16 }
 0x1b1   : > { %v661_v28 = vand.u32 4294901760, %v3519_v17  ;;  %v668_v40 = vand.u32 4294901760, %v3523_v18  ;;  %v1906_v41 = vpack.c.bf16 %v628_v21, %v621_v20  ;;  %v635_v29 = vand.u32 4294901760, %v634_v2 }
 0x1b2   : > { %1889 = vmatpush3.bf16.msk.msra.mxu1 %vm3390_vm2, %v2681_v36  ;;  %1985 = vmatpush3.bf16.msk.msra.mxu0 %vm3390_vm2, %v2681_v36  ;;  %v642_v42 = vand.u32 4294901760, %v641_v22  ;;  %v3548_v45 = vsub.f32 %v2993_v30, %v2993_v30  ;;  %v649_v51 = vand.u32 4294901760, %v648_v24  ;;  %v675_v52 = vand.u32 4294901760, %v3535_v25 }
 0x1b3   : > { %1891 = vmatprep.subr.msk.bf16.mxu1 %vm3429_vm3, %v2681_v36  ;;  %1987 = vmatprep.subr.msk.bf16.mxu0 %vm3429_vm3, %v2681_v36  ;;  %v656_v55 = vand.u32 4294901760, %v655_v27  ;;  %v662_v57 = vsub.f32 %v3519_v17, %v661_v28  ;;  %v669_v60 = vsub.f32 %v3523_v18, %v668_v40  ;;  %v3555_v61 = vsub.f32 %v2998_v31, %v2998_v31 }
 0x1b4   : > { %1692 = vmatprep.mubr.f32.mxu1 %v586_v1  ;;  %v1910_v30 = vpack.c.bf16 %v642_v42, %v635_v29  ;;  %v2006_v62 = vpack.c.bf16 %v640_v6, %v633_v5  ;;  %v682_v63 = vand.u32 4294901760, %v3548_v45  ;;  %v3560_v1 = vsub.f32 %v3013_v32, %v3013_v32 }
 0x1b5   : > { %v676_v8 = vsub.f32 %v3535_v25, %v675_v52  ;;  %v1914_v31 = vpack.c.bf16 %v656_v55, %v649_v51  ;;  %v663_v9 = vand.u32 4294901760, %v662_v57  ;;  %v670_v10 = vand.u32 4294901760, %v669_v60 }
 0x1b6   : > { %1893 = vmatpush3.bf16.msk.msra.mxu1 %vm3429_vm3, %v2681_v36  ;;  %1989 = vmatpush3.bf16.msk.msra.mxu0 %vm3429_vm3, %v2681_v36  ;;  %v689_v5 = vand.u32 4294901760, %v3555_v61  ;;  %v683_v6 = vsub.f32 %v3548_v45, %v682_v63  ;;  %v696_v32 = vand.u32 4294901760, %v3560_v1  ;;  %v3570_v11 = vsub.f32 %v3018_v33, %v3018_v33 }
 0x1b7   : > { %1895 = vmatprep.subr.msk.bf16.mxu1 %vm3468_vm4, %v2681_v36  ;;  %1991 = vmatprep.subr.msk.bf16.mxu0 %vm3468_vm4, %v2681_v36  ;;  %v1918_v14 = vpack.c.bf16 %v670_v10, %v663_v9  ;;  %v677_v2 = vand.u32 4294901760, %v676_v8  ;;  %v1938_v55 = vpack.c.bf16 %v3421_v53, %v3406_v49  ;;  %v1946_v35 = vpack.c.bf16 %v3487_v7, %v3475_v4 }
 0x1b8   : > { %v697_v20 = vsub.f32 %v3560_v1, %v696_v32  ;;  %v703_v21 = vand.u32 4294901760, %v3570_v11  ;;  %v1950_v37 = vpack.c.bf16 %v3523_v18, %v3519_v17  ;;  %v1954_v38 = vpack.c.bf16 %v3548_v45, %v3535_v25 }
 0x1b9   : > { %v1958_v39 = vpack.c.bf16 %v3560_v1, %v3555_v61 }
 0x1ba   : > { %1897 = vmatpush3.bf16.msk.msra.mxu1 %vm3468_vm4, %v2681_v36  ;;  %1993 = vmatpush3.bf16.msk.msra.mxu0 %vm3468_vm4, %v2681_v36  ;;  %v698_v24 = vand.u32 4294901760, %v697_v20 }
 0x1bb   : > { %1899 = vmatprep.subr.msk.bf16.mxu1 %vm3503_vm7, %v2681_v36  ;;  %1995 = vmatprep.subr.msk.bf16.mxu0 %vm3503_vm7, %v2681_v36 }
 0x1be   : > { %1901 = vmatpush3.bf16.msk.msra.mxu1 %vm3503_vm7, %v2681_v36  ;;  %1997 = vmatpush3.bf16.msk.msra.mxu0 %vm3503_vm7, %v2681_v36 }
 0x1bf   : > { %1903 = vmatprep.subr.bf16.mxu1 %v1902_v19  ;;  %1999 = vmatprep.subr.bf16.mxu0 %v1998_v13 }
 0x1c1   : > { %1693 = vmatmul.mubr.f32.vlgmr.msra.gmra.mrb[0].mxu1 %v596_v23  ;;  %1798 = vmatmul.mubr.f32.vlgmr.msra.gmra.mrb[0].mxu0 %v594_v3  ;;  %v2010_v3 = vpack.c.bf16 %v654_v16, %v647_v15  ;;  %v2014_v15 = vpack.c.bf16 %v668_v40, %v661_v28  ;;  %v690_v16 = vsub.f32 %v3555_v61, %v689_v5 }
 0x1c2   : > { %1905 = vmatpush3.bf16.msra.mxu1 %v1902_v19  ;;  %2001 = vmatpush3.bf16.msra.mxu0 %v1998_v13  ;;  %v3574_v13 = vsub.f32 %v3023_v34, %v3023_v34  ;;  %v684_v19 = vand.u32 4294901760, %v683_v6  ;;  %v2018_v34 = vpack.c.bf16 %v682_v63, %v675_v52  ;;  %v2022_v40 = vpack.c.bf16 %v696_v32, %v689_v5 }
 0x1c3   : > { %1907 = vmatprep.subr.bf16.mxu1 %v1906_v41  ;;  %2003 = vmatprep.subr.bf16.mxu0 %v2002_v26  ;;  %v691_v22 = vand.u32 4294901760, %v690_v16  ;;  %v1934_v52 = vpack.c.bf16 %v3382_v44, %v3378_v43  ;;  %v1942_v43 = vpack.c.bf16 %v3450_v59, %v3446_v58 }
 0x1c4   : > { %1727 = vmatprep.mubr.f32.mxu1 %v3394_v47  ;;  %1832 = vmatprep.mubr.f32.mxu0 %v3394_v47  ;;  %v710_v33 = vand.u32 4294901760, %v3574_v13  ;;  %v1922_v23 = vpack.c.bf16 %v684_v19, %v677_v2  ;;  %v1962_v44 = vpack.c.bf16 %v3574_v13, %v3570_v11 }
 0x1c5   : > { %v1926_v28 = vpack.c.bf16 %v698_v24, %v691_v22 }
 0x1c6   : > { %1909 = vmatpush3.bf16.msra.mxu1 %v1906_v41  ;;  %2005 = vmatpush3.bf16.msra.mxu0 %v2002_v26  ;;  %v704_v26 = vsub.f32 %v3570_v11, %v703_v21  ;;  %v711_v27 = vsub.f32 %v3574_v13, %v710_v33  ;;  %v2026_v51 = vpack.c.bf16 %v710_v33, %v703_v21 }
 0x1c7   : > { %1911 = vmatprep.subr.bf16.mxu1 %v1910_v30  ;;  %2007 = vmatprep.subr.bf16.mxu0 %v2006_v62 }
 0x1c8   : > { %v705_v41 = vand.u32 4294901760, %v704_v26  ;;  %v712_v29 = vand.u32 4294901760, %v711_v27 }
 0x1ca   : > { %1913 = vmatpush3.bf16.msra.mxu1 %v1910_v30  ;;  %2009 = vmatpush3.bf16.msra.mxu0 %v2006_v62  ;;  %v1930_v42 = vpack.c.bf16 %v712_v29, %v705_v41 }
 0x1cb   : > { %1915 = vmatprep.subr.bf16.mxu1 %v1914_v31  ;;  %2011 = vmatprep.subr.bf16.mxu0 %v2010_v3 }
 0x1ce   : > { %1917 = vmatpush3.bf16.msra.mxu1 %v1914_v31  ;;  %2013 = vmatpush3.bf16.msra.mxu0 %v2010_v3 }
 0x1cf   : > { %1919 = vmatprep.subr.bf16.mxu1 %v1918_v14  ;;  %2015 = vmatprep.subr.bf16.mxu0 %v2014_v15 }
 0x1d2   : > { %1921 = vmatpush3.bf16.msra.mxu1 %v1918_v14  ;;  %2017 = vmatpush3.bf16.msra.mxu0 %v2014_v15 }
 0x1d3   : > { %1923 = vmatprep.subr.bf16.mxu1 %v1922_v23  ;;  %2019 = vmatprep.subr.bf16.mxu0 %v2018_v34 }
 0x1d6   : > { %1925 = vmatpush3.bf16.msra.mxu1 %v1922_v23  ;;  %2021 = vmatpush3.bf16.msra.mxu0 %v2018_v34 }
 0x1d7   : > { %1927 = vmatprep.subr.bf16.mxu1 %v1926_v28  ;;  %2023 = vmatprep.subr.bf16.mxu0 %v2022_v40 }
 0x1da   : > { %1929 = vmatpush3.bf16.msra.mxu1 %v1926_v28  ;;  %2025 = vmatpush3.bf16.msra.mxu0 %v2022_v40 }
 0x1db   : > { %1931 = vmatprep.subr.bf16.mxu1 %v1930_v42  ;;  %2027 = vmatprep.subr.bf16.mxu0 %v2026_v51 }
 0x1de   : > { %1933 = vmatpush3.bf16.msra.mxu1 %v1930_v42  ;;  %2029 = vmatpush3.bf16.msra.mxu0 %v2026_v51 }
 0x1df   : > { %1935 = vmatprep.subr.bf16.mxu1 %v1934_v52  ;;  %2031 = vmatprep.subr.msk.bf16.mxu0 %vm3300_vm15, %v2681_v36 }
 0x1e1   : > { %1728 = vmatmul.mubr.f32.vlgmr.msra.gmra.mrb[0].mxu1 %v3396_v48  ;;  %1833 = vmatmul.mubr.f32.vlgmr.msra.gmra.mrb[0].mxu0 %v3396_v48 }
 0x1e2   : > { %1937 = vmatpush3.bf16.msra.mxu1 %v1934_v52  ;;  %2033 = vmatpush3.bf16.msk.msra.mxu0 %vm3300_vm15, %v2681_v36 }
 0x1e3   : > { %1939 = vmatprep.subr.bf16.mxu1 %v1938_v55  ;;  %2035 = vmatprep.subr.msk.bf16.mxu0 %vm3316_vm14, %v2681_v36 }
 0x1e4   : > { %1762 = vmatprep.mubr.f32.mxu1 %v3415_v50  ;;  %1867 = vmatprep.mubr.f32.mxu0 %v3394_v47 }
 0x1e6   : > { %1941 = vmatpush3.bf16.msra.mxu1 %v1938_v55  ;;  %2037 = vmatpush3.bf16.msk.msra.mxu0 %vm3316_vm14, %v2681_v36 }
 0x1e7   : > { %1943 = vmatprep.subr.bf16.mxu1 %v1942_v43  ;;  %2039 = vmatprep.subr.msk.bf16.mxu0 %vm3338_vm0, %v2681_v36 }
 0x1ea   : > { %1945 = vmatpush3.bf16.msra.mxu1 %v1942_v43  ;;  %2041 = vmatpush3.bf16.msk.msra.mxu0 %vm3338_vm0, %v2681_v36 }
 0x1eb   : > { %1947 = vmatprep.subr.bf16.mxu1 %v1946_v35  ;;  %2043 = vmatprep.subr.msk.bf16.mxu0 %vm3360_vm1, %v2681_v36 }
 0x1ee   : > { %1949 = vmatpush3.bf16.msra.mxu1 %v1946_v35  ;;  %2045 = vmatpush3.bf16.msk.msra.mxu0 %vm3360_vm1, %v2681_v36 }
 0x1ef   : > { %1951 = vmatprep.subr.bf16.mxu1 %v1950_v37  ;;  %2047 = vmatprep.subr.msk.bf16.mxu0 %vm3390_vm2, %v2681_v36 }
 0x1f2   : > { %1953 = vmatpush3.bf16.msra.mxu1 %v1950_v37  ;;  %2049 = vmatpush3.bf16.msk.msra.mxu0 %vm3390_vm2, %v2681_v36 }
 0x1f3   : > { %1955 = vmatprep.subr.bf16.mxu1 %v1954_v38  ;;  %2051 = vmatprep.subr.msk.bf16.mxu0 %vm3429_vm3, %v2681_v36 }
 0x1f6   : > { %1957 = vmatpush3.bf16.msra.mxu1 %v1954_v38  ;;  %2053 = vmatpush3.bf16.msk.msra.mxu0 %vm3429_vm3, %v2681_v36 }
 0x1f7   : > { %1959 = vmatprep.subr.bf16.mxu1 %v1958_v39  ;;  %2055 = vmatprep.subr.msk.bf16.mxu0 %vm3468_vm4, %v2681_v36 }
 0x1fa   : > { %1961 = vmatpush3.bf16.msra.mxu1 %v1958_v39  ;;  %2057 = vmatpush3.bf16.msk.msra.mxu0 %vm3468_vm4, %v2681_v36 }
 0x1fb   : > { %1963 = vmatprep.subr.bf16.mxu1 %v1962_v44  ;;  %2059 = vmatprep.subr.msk.bf16.mxu0 %vm3503_vm7, %v2681_v36 }
 0x1fe   : > { %1965 = vmatpush3.bf16.msra.mxu1 %v1962_v44  ;;  %2061 = vmatpush3.bf16.msk.msra.mxu0 %vm3503_vm7, %v2681_v36 }
 0x201   : > { %1763 = vmatmul.mubr.f32.vlgmr.msra.gmra.mrb[0].mxu1 %v3435_v56  ;;  %1868 = vmatmul.mubr.f32.vlgmr.msra.gmra.mrb[0].mxu0 %v3396_v48 }
 0x2d4   : > { %v1764_v46 = vpop.f32.mrb[0].mxu1  ;;  %v1869_v47 = vpop.f32.mrb[0].mxu0 }
 0x2d5   : > { %v2062_v49 = vadd.f32 %v1869_v47, %v1764_v46  ;;  %v859_v50 = vpop.f32.mrb[1].mxu1  ;;  %v1175_v53 = vpop.f32.mrb[1].mxu0 }
 0x2d6   : > { %v2063_v54 = vadd.f32 %v1175_v53, %v859_v50 }
 0x2d7   : > { %v2074_v58 = vtrunc.f32 %v2062_v49 }
 0x2d8   : > { %v2072_v59 = vtrunc.f32 %v2063_v54 }
 0x2d9   : > { %v2075_v36 = vcvt.f32.s32 %v2074_v58 }
 0x2da   : > { %v2073_v48 = vcvt.f32.s32 %v2072_v59 }
 0x2db   : > { %1188 = vst [vmem:[%s3292_s23] sm:$0xff] %v2075_v36 }
 0x2dc   : > { %1186 = vst [vmem:[%s3288_s13] sm:$0xff] %v2073_v48 }
 0x2dd   : > { %2546 = shalt.err (!%p2543_p5)
}
 0x2de   : > { %s2547_s26 = scalar_lea.hbm %s3658_s20, 128  ;;  %s2551_s16 = scalar_lea.hbm %s3737_s5, 256 }
 0x2df   : > { %p2548_p6 = scmp.ne.s32.totalorder %s3658_s20, %s2547_s26  ;;  %p2552_p11 = scmp.lt.u32.totalorder %s3658_s20, %s3737_s5 }
 0x2e0   : > { %p2553_p12 = scmp.lt.u32.totalorder %s2551_s16, %s2547_s26  ;;  %p2555_p0 = scmp.lt.u32.totalorder %s2547_s26, %s3658_s20 }
 0x2e1   : > { %p2549_p7 = pnand %p2548_p6, %p2764_p8 }
 0x2e2   : > { %p2554_p13 = por %p2553_p12, %p2552_p11 }
 0x2e3   : > { %p2550_p10 = pneg %p2549_p7 }
 0x2e4   : > { %p2556_p1 = por %p2555_p0, %p2554_p13 }
 0x2e6   : > { %p2557_p2 = pnand %p2556_p1, %p2550_p10 }
 0x2e8   : > { %2560 = shalt.err (!%p2557_p2)
}
 0x2e9   : > { %2077 = dma.vmem_to_hbm [thread:$0]  (%p2764_p8), %s3660_s10, 128, %s3658_s20, %s1195_s28  }
 0x2ea   : > { %s1190_s22 = scalar_lea.sflag [#allocation7], %s2775_s14  ;;  %s2561_s13 = scalar_lea.vmem %s3667_s18, 128 }
 0x2eb   : > { %p2562_p3 = scmp.ne.s32.totalorder %s3667_s18, %s2561_s13  ;;  %s2683_s7 = smov [#allocation6]  }
 0x2ec   : > { %s2565_s23 = sshll.u32 %s2683_s7, 4  ;;  %s2566_s23 = int_to_ptr.vmem [resolvable:$false] %s2565_s23 }
 0x2ed   : > { %p2563_p4 = pnand %p2562_p3, %p2764_p8  ;;  %s2567_s21 = scalar_lea.vmem %s2566_s23, 256 }
 0x2ee   : > { %p2568_p6 = scmp.lt.s32.totalorder %s3667_s18, %s2566_s23  ;;  %p2569_p7 = scmp.lt.s32.totalorder %s2567_s21, %s2561_s13 }
 0x2ef   : > { %p2564_p5 = pneg %p2563_p4 }
 0x2f0   : > { %p2570_p10 = por %p2569_p7, %p2568_p6 }
 0x2f2   : > { %p2571_p11 = pnand %p2570_p10, %p2564_p5 }
 0x2f4   : > { %2574 = shalt.err (!%p2571_p11)
}
 0x2f5   : > { %s2575_s14 = scalar_lea.hbm %s3665_s0, 128  ;;  %s2579_s17 = scalar_lea.hbm %s3736_s4, 256 }
 0x2f6   : > { %p2576_p12 = scmp.ne.s32.totalorder %s3665_s0, %s2575_s14  ;;  %p2580_p1 = scmp.lt.u32.totalorder %s3665_s0, %s3736_s4 }
 0x2f7   : > { %p2581_p2 = scmp.lt.u32.totalorder %s2579_s17, %s2575_s14  ;;  %p2583_p4 = scmp.lt.u32.totalorder %s2575_s14, %s3665_s0 }
 0x2f8   : > { %p2577_p13 = pnand %p2576_p12, %p2764_p8 }
 0x2f9   : > { %p2582_p3 = por %p2581_p2, %p2580_p1 }
 0x2fa   : > { %p2578_p0 = pneg %p2577_p13 }
 0x2fb   : > { %p2584_p5 = por %p2583_p4, %p2582_p3 }
 0x2fd   : > { %p2585_p6 = pnand %p2584_p5, %p2578_p0 }
 0x2ff   : > { %2588 = shalt.err (!%p2585_p6)
}
 0x300   : > { %2076 = dma.vmem_to_hbm [thread:$0]  (%p2764_p8), %s3667_s18, 128, %s3665_s0, %s1190_s22  }
 0x301 PF: > { %s3776_s1 = sld [smem:[#allocation63_spill]]  ;;  %p2087_p7 = scmp.ge.s32.totalorder %s2661_s6, 2 }
 0x303   : > { %p2081_p10 = pnand %p2087_p7, %p2768_p9 }
 0x307   : > { %s1233_s30 = sand.u32 1, %s3776_s1  }
 0x308   : > { %s1234_s29 = scalar_lea.sflag [#allocation7], %s1233_s30 }
 0x309   : > { %2640 = dma.done.wait (!%p2081_p10), %s1234_s29, 128  }
 0x30a   : > { %2642 = vsyncadd (!%p2081_p10), %s1234_s29, 4294967168  ;;  %s1243_s19 = scalar_lea.sflag [#allocation9], %s1233_s30 }
 0x30b   : > { %2644 = dma.done.wait (!%p2081_p10), %s1243_s19, 128  }
 0x30c   : > { %2646 = vsyncadd (!%p2081_p10), %s1243_s19, 4294967168  ;;  %s3778_s6 = sld [smem:[#allocation66_spill]]  ;;  %s3779_s28 = sld [smem:[#allocation64_spill]] }
 0x30d   : > { %s3780_s29 = sld [smem:[#allocation65_spill]]  ;;  %s3781_s30 = sld [smem:[#allocation67_spill]] }
 0x312   : > { %p23_p8 = scmp.ge.s32.totalorder %s3778_s6, 4  }
 0x314   :  { %25 = sbr.rel (!%p23_p8) target bundleno = 17 (0x11), region = 198 }
 0x31b   :  { %1248 = vsyncpa [#allocation7], 1 }
 0x31c   :  { %1250 = vsyncpa [#allocation7 + $0x1], 1 }
 0x31d   :  { %1251 = vsyncpa [#allocation9], 1 }
 0x31e   :  { %1253 = vsyncpa [#allocation9 + $0x1], 1 }
 0x31f   :  { %1254 = vsyncmov [#allocation3] }
 0x322   :  { %s1255_s12 = vpop.sfrf %1254 }
 0x323   :  { %p1536_p9 = scmp.ne.s32.totalorder %s1255_s12, 0 }
 0x325   :  { %1259 = shalt.err (%p1536_p9)  }
 0x326   :  { %1261 = vsyncmov [#allocation3 + $0x1] }
 0x329   :  { %s1262_s18 = vpop.sfrf %1261 }
 0x32a   :  { %p1537_p11 = scmp.ne.s32.totalorder %s1262_s18, 0 }
 0x32c   :  { %1266 = shalt.err (%p1537_p11)  }
 0x32d   :  { %1268 = vsyncmov [#allocation3 + $0x2] }
 0x330   :  { %s1269_s0 = vpop.sfrf %1268 }
 0x331   :  { %p1538_p12 = scmp.ne.s32.totalorder %s1269_s0, 0 }
 0x333   :  { %1273 = shalt.err (%p1538_p12)  }
 0x334   :  { %1275 = vsyncmov [#allocation3 + $0x3] }
 0x337   :  { %s1276_s25 = vpop.sfrf %1275 }
 0x338   :  { %p1539_p13 = scmp.ne.s32.totalorder %s1276_s25, 0 }
 0x33a   :  { %1280 = shalt.err (%p1539_p13)  }
 0x33b   :  { %1282 = vsyncmov [#allocation3 + $0x4] }
 0x33e   :  { %s1283_s2 = vpop.sfrf %1282 }
 0x33f   :  { %p1540_p0 = scmp.ne.s32.totalorder %s1283_s2, 0 }
 0x341   :  { %1287 = shalt.err (%p1540_p0)  }
 0x342   :  { %1289 = vsyncmov [#allocation3 + $0x5] }
 0x345   :  { %s1290_s3 = vpop.sfrf %1289 }
 0x346   :  { %p1541_p1 = scmp.ne.s32.totalorder %s1290_s3, 0 }
 0x348   :  { %1294 = shalt.err (%p1541_p1)  }
 0x349   :  { %1296 = vsyncmov [#allocation3 + $0x6] }
 0x34c   :  { %s1297_s4 = vpop.sfrf %1296 }
 0x34d   :  { %p1542_p2 = scmp.ne.s32.totalorder %s1297_s4, 0 }
 0x34f   :  { %1301 = shalt.err (%p1542_p2)  }
 0x350   :  { %1303 = vsyncmov [#allocation3 + $0x7] }
 0x353   :  { %s1304_s5 = vpop.sfrf %1303 }
 0x354   :  { %p1543_p3 = scmp.ne.s32.totalorder %s1304_s5, 0 }
 0x356   :  { %1308 = shalt.err (%p1543_p3)  }
 0x357   :  { %1310 = vsyncmov [#allocation3 + $0x8] }
 0x35a   :  { %s1311_s6 = vpop.sfrf %1310 }
 0x35b   :  { %p1544_p4 = scmp.ne.s32.totalorder %s1311_s6, 0 }
 0x35d   :  { %1315 = shalt.err (%p1544_p4)  }
 0x35e   :  { %1317 = vsyncmov [#allocation3 + $0x9] }
 0x361   :  { %s1318_s26 = vpop.sfrf %1317 }
 0x362   :  { %p1545_p5 = scmp.ne.s32.totalorder %s1318_s26, 0 }
 0x364   :  { %1322 = shalt.err (%p1545_p5)  }
 0x365   :  { %1324 = vsyncmov [#allocation3 + $0xa] }
 0x368   :  { %s1325_s8 = vpop.sfrf %1324 }
 0x369   :  { %p1546_p6 = scmp.ne.s32.totalorder %s1325_s8, 0 }
 0x36b   :  { %1329 = shalt.err (%p1546_p6)  }
 0x36c   :  { %1331 = vsyncmov [#allocation3 + $0xb] }
 0x36f   :  { %s1332_s24 = vpop.sfrf %1331 }
 0x370   :  { %p1547_p7 = scmp.ne.s32.totalorder %s1332_s24, 0 }
 0x372   :  { %1336 = shalt.err (%p1547_p7)  }
 0x373   :  { %1338 = vsyncmov [#allocation3 + $0xc] }
 0x376   :  { %s1339_s16 = vpop.sfrf %1338 }
 0x377   :  { %p1548_p10 = scmp.ne.s32.totalorder %s1339_s16, 0 }
 0x379   :  { %1343 = shalt.err (%p1548_p10)  }
 0x37a   :  { %1345 = vsyncmov [#allocation3 + $0xd] }
 0x37d   :  { %s1346_s15 = vpop.sfrf %1345 }
 0x37e   :  { %p1549_p8 = scmp.ne.s32.totalorder %s1346_s15, 0 }
 0x380   :  { %1350 = shalt.err (%p1549_p8)  }
 0x381   :  { %1352 = vsyncmov [#allocation3 + $0xe] }
 0x384   :  { %s1353_s11 = vpop.sfrf %1352 }
 0x385   :  { %p1550_p9 = scmp.ne.s32.totalorder %s1353_s11, 0 }
 0x387   :  { %1357 = shalt.err (%p1550_p9)  }
 0x388   :  { %1359 = vsyncmov [#allocation3 + $0xf] }
 0x38b   :  { %s1360_s22 = vpop.sfrf %1359 }
 0x38c   :  { %p1551_p11 = scmp.ne.s32.totalorder %s1360_s22, 0 }
 0x38e   :  { %1364 = shalt.err (%p1551_p11)  }

</bundles_post_ra>
